<compile_context>
chip_gen: v7x
topology: tpu7x:2x2x1
jax: 0.10.0
libtpu: 0.0.40
codegen_flags: <defaults>
</compile_context>

<pallas_src>
import numpy as np
import jax
import jax.numpy as jnp
from jax.experimental import pallas as pl
from jax.experimental.pallas import tpu as pltpu

BN_EPS = 1e-5
ACT_DTYPE = jnp.bfloat16                 # activation / weight storage dtype
_VMEM_LIMIT = 48 * 1024 * 1024           # explicit scoped-VMEM ceiling


def _pick_band(h, row_bytes, budget=2 * 1024 * 1024):
    """Largest divisor of h whose band fits the (approx) VMEM row budget."""
    best = 1
    for t in range(1, h + 1):
        if h % t == 0 and t * row_bytes <= budget:
            best = t
    return best


def _cparams(sem):
    return pltpu.CompilerParams(dimension_semantics=sem,
                                vmem_limit_bytes=_VMEM_LIMIT)


# ---------------------------------------------------------------------------
# Kernel bodies
# ---------------------------------------------------------------------------
def _make_head_kernel(TH, WO, C4, COUT, HALF):
    """Fused stride-2 3x3 downsample (as 4 taps over space-to-depth input)
    + merged conv1|conv2 1x1.  Downsample result never leaves VMEM."""
    M = TH * WO

    def kernel(xb_ref, wd_ref, bd_ref, w12_ref, b12_ref, o1_ref, o2_ref):
        xv = xb_ref[0]                                   # (TH+1, WO+1, C4) bf16
        acc = jnp.zeros((M, COUT), jnp.float32) + bd_ref[...]
        for r in range(2):                               # static unroll: 4 taps
            for c in range(2):
                tap = xv[r:r + TH, c:c + WO, :].reshape(M, C4)
                acc = acc + jnp.dot(tap, wd_ref[2 * r + c],
                                    preferred_element_type=jnp.float32)
        ds = jnp.maximum(acc, 0.0).astype(ACT_DTYPE)     # downsample output
        y = jnp.dot(ds, w12_ref[...], preferred_element_type=jnp.float32)
        y = jnp.maximum(y + b12_ref[...], 0.0)
        o1_ref[0] = y[:, :HALF].astype(o1_ref.dtype).reshape(TH, WO, HALF)
        o2_ref[0] = y[:, HALF:].astype(o2_ref.dtype).reshape(TH, WO, HALF)

    return kernel


def _make_block_kernel(H, W, C):
    """One DarknetBlock: mid = relu(1x1(x)); y = relu(3x3(mid)); out = x + y.
    `mid` stays in a VMEM scratch; the 3x3 is 9 accumulating dots (no 9C
    concat); only the 1-pixel halo of the scratch is zeroed."""
    HW = H * W

    def kernel(x_ref, w1_ref, b1_ref, w2_ref, b2_ref, o_ref, pad_ref):
        x = x_ref[0].reshape(HW, C)                      # bf16
        mid = jnp.dot(x, w1_ref[...], preferred_element_type=jnp.float32)
        mid = jnp.maximum(mid + b1_ref[...], 0.0)        # f32

        # Zero ONLY the halo (interior is fully overwritten right after).
        pad_ref[0:1, :, :] = jnp.zeros((1, W + 2, C), jnp.float32)
        pad_ref[H + 1:H + 2, :, :] = jnp.zeros((1, W + 2, C), jnp.float32)
        pad_ref[:, 0:1, :] = jnp.zeros((H + 2, 1, C), jnp.float32)
        pad_ref[:, W + 1:W + 2, :] = jnp.zeros((H + 2, 1, C), jnp.float32)
        pad_ref[1:H + 1, 1:W + 1, :] = mid.reshape(H, W, C)

        acc = jnp.zeros((HW, C), jnp.float32) + b2_ref[...]
        for dy in range(3):                              # static unroll: 9 taps
            for dx in range(3):
                tap = pad_ref[dy:dy + H, dx:dx + W, :].reshape(HW, C)
                acc = acc + jnp.dot(tap.astype(ACT_DTYPE), w2_ref[3 * dy + dx],
                                    preferred_element_type=jnp.float32)
        y = jnp.maximum(acc, 0.0)
        o_ref[0] = (x.astype(jnp.float32) + y).astype(o_ref.dtype).reshape(H, W, C)

    return kernel


def _make_concat_kernel(TH, WO, HALF, COUT):
    """Fused torch.cat((out1, out2), C) + 1x1 out_conv + ReLU."""
    M = TH * WO

    def kernel(a_ref, b_ref, wt_ref, wb_ref, bias_ref, o_ref):
        a = a_ref[0].reshape(M, HALF)
        b = b_ref[0].reshape(M, HALF)
        acc = jnp.dot(a, wt_ref[...], preferred_element_type=jnp.float32)
        acc = acc + jnp.dot(b, wb_ref[...], preferred_element_type=jnp.float32)
        acc = jnp.maximum(acc + bias_ref[...], 0.0)
        o_ref[0] = acc.astype(o_ref.dtype).reshape(TH, WO, COUT)

    return kernel


# ---------------------------------------------------------------------------
# pallas_call wrappers
# ---------------------------------------------------------------------------
def _fused_head(x_nhwc, w_ds, b_ds, w12, b12, half):
    N, H, W, cin = x_nhwc.shape
    assert H % 2 == 0 and W % 2 == 0, "stride-2 stage expects even H/W"
    Ho, Wo = H // 2, W // 2
    c4 = 4 * cin
    cout = w_ds.shape[2]

    # One-pass space-to-depth (stride-2 3x3 becomes an unstrided 2x2 conv),
    # zero-pad the top row / left col, band rows with a 1-row halo.
    x4 = x_nhwc.reshape(N, Ho, 2, Wo, 2, cin)
    x4 = x4.transpose(0, 1, 3, 2, 4, 5).reshape(N, Ho, Wo, c4)
    x4 = jnp.pad(x4, ((0, 0), (1, 0), (1, 0), (0, 0)))
    th = _pick_band(Ho, (Wo + 1) * c4 * 2)
    nb = Ho // th
    xb = jnp.stack([x4[:, b * th: b * th + th + 1] for b in range(nb)], axis=1)
    xb = xb.reshape(N * nb, th + 1, Wo + 1, c4).astype(ACT_DTYPE)

    kernel = _make_head_kernel(th, Wo, c4, cout, half)
    out_sds = jax.ShapeDtypeStruct((N, Ho, Wo, half), ACT_DTYPE)
    return pl.pallas_call(
        kernel,
        grid=(N, nb),
        in_specs=[
            pl.BlockSpec((1, th + 1, Wo + 1, c4),
                         lambda n, b: (n * nb + b, 0, 0, 0)),
            pl.BlockSpec((4, c4, cout), lambda n, b: (0, 0, 0)),
            pl.BlockSpec((1, cout), lambda n, b: (0, 0)),
            pl.BlockSpec((cout, cout), lambda n, b: (0, 0)),
            pl.BlockSpec((1, cout), lambda n, b: (0, 0)),
        ],
        out_specs=(
            pl.BlockSpec((1, th, Wo, half), lambda n, b: (n, b, 0, 0)),
            pl.BlockSpec((1, th, Wo, half), lambda n, b: (n, b, 0, 0)),
        ),
        out_shape=(out_sds, out_sds),
        compiler_params=_cparams(("parallel", "parallel")),
    )(xb, w_ds, b_ds, w12, b12)


def _darknet_block(x, w1, b1, w2, b2):
    N, H, W, C = x.shape
    kernel = _make_block_kernel(H, W, C)
    # TODO(synk): row-band tiling with a 1x1-recompute halo for very large H*W.
    return pl.pallas_call(
        kernel,
        grid=(N,),
        in_specs=[
            pl.BlockSpec((1, H, W, C), lambda n: (n, 0, 0, 0)),
            pl.BlockSpec((C, C), lambda n: (0, 0)),
            pl.BlockSpec((1, C), lambda n: (0, 0)),
            pl.BlockSpec((9, C, C), lambda n: (0, 0, 0)),
            pl.BlockSpec((1, C), lambda n: (0, 0)),
        ],
        out_specs=pl.BlockSpec((1, H, W, C), lambda n: (n, 0, 0, 0)),
        out_shape=jax.ShapeDtypeStruct((N, H, W, C), x.dtype),
        scratch_shapes=[pltpu.VMEM((H + 2, W + 2, C), jnp.float32)],
        compiler_params=_cparams(("parallel",)),
    )(x, w1, b1, w2, b2)


def _concat_out_conv(out1, out2, wt, wb, bias):
    N, Ho, Wo, half = out1.shape
    cout = wt.shape[1]
    th = _pick_band(Ho, Wo * (2 * half + cout) * 2)
    nb = Ho // th
    kernel = _make_concat_kernel(th, Wo, half, cout)
    return pl.pallas_call(
        kernel,
        grid=(N, nb),
        in_specs=[
            pl.BlockSpec((1, th, Wo, half), lambda n, b: (n, b, 0, 0)),
            pl.BlockSpec((1, th, Wo, half), lambda n, b: (n, b, 0, 0)),
            pl.BlockSpec((half, cout), lambda n, b: (0, 0)),
            pl.BlockSpec((half, cout), lambda n, b: (0, 0)),
            pl.BlockSpec((1, cout), lambda n, b: (0, 0)),
        ],
        out_specs=pl.BlockSpec((1, th, Wo, cout), lambda n, b: (n, b, 0, 0)),
        out_shape=jax.ShapeDtypeStruct((N, Ho, Wo, cout), ACT_DTYPE),
        compiler_params=_cparams(("parallel", "parallel")),
    )(out1, out2, wt, wb, bias)


# ---------------------------------------------------------------------------
# Parameter init (matches nn.Module shapes) + one-time BN folding / layout
# ---------------------------------------------------------------------------
def init_cba(key, cin, cout, k):
    kw, kg, kb, km, kv = jax.random.split(key, 5)
    return {
        "k": k,
        "w": jax.random.normal(kw, (cout, cin, k, k), jnp.float32) * 0.1,
        "gamma": jax.random.uniform(kg, (cout,), jnp.float32, 0.5, 1.5),
        "beta": jax.random.normal(kb, (cout,), jnp.float32) * 0.1,
        "mean": jax.random.normal(km, (cout,), jnp.float32) * 0.1,
        "var": jax.random.uniform(kv, (cout,), jnp.float32, 0.5, 1.5),
    }


def init_stage(key, n, cin, cout):
    keys = jax.random.split(key, 4 + 2 * n)
    half = cout // 2
    params = {
        "conv": init_cba(keys[0], cin, cout, 3),       # stride-2 downsample
        "conv1": init_cba(keys[1], cout, half, 1),
        "conv2": init_cba(keys[2], cout, half, 1),
        "out_conv": init_cba(keys[3], cout, cout, 1),
        "blocks": [],
    }
    for i in range(n):
        params["blocks"].append({
            "conv1": init_cba(keys[4 + 2 * i], half, half, 1),   # expansion=1
            "conv2": init_cba(keys[5 + 2 * i], half, half, 3),
        })
    return params


def _fold_bn(p):
    scale = p["gamma"] / jnp.sqrt(p["var"] + BN_EPS)
    return p["w"] * scale[:, None, None, None], p["beta"] - p["mean"] * scale


def _fold_bn_1x1(p):
    w, b = _fold_bn(p)
    return w[:, :, 0, 0].T, b                            # (cin, cout), (cout,)


def prepare_stage(params):
    """One-time: fold eval-mode BN, re-layout weights (bf16), merge conv1|conv2,
    split out_conv, and build the 2x2-over-space-to-depth downsample weight."""
    cout, cin = params["conv"]["w"].shape[:2]
    half = cout // 2

    # stride-2 3x3 -> 2x2 conv over space-to-depth input (4*cin channels).
    wd3, bd = _fold_bn(params["conv"])                   # (cout, cin, 3, 3)
    w4 = jnp.zeros((2, 2, 4, cin, cout), jnp.float32)
    for dy in range(3):
        for dx in range(3):
            rof = 0 if dy == 0 else 1
            sr = 0 if dy == 1 else 1
            cof = 0 if dx == 0 else 1
            sc = 0 if dx == 1 else 1
            w4 = w4.at[rof, cof, 2 * sr + sc].set(wd3[:, :, dy, dx].T)
    w_ds = w4.reshape(4, 4 * cin, cout).astype(ACT_DTYPE)
    b_ds = bd.reshape(1, cout)

    # CSP head conv1 | conv2 merged into a single (cout, cout) weight.
    w1, b1 = _fold_bn_1x1(params["conv1"])
    w2, b2 = _fold_bn_1x1(params["conv2"])
    w12 = jnp.concatenate([w1, w2], axis=1).astype(ACT_DTYPE)
    b12 = jnp.concatenate([b1, b2]).reshape(1, cout)

    blocks = []
    for blk in params["blocks"]:
        bw1, bb1 = _fold_bn_1x1(blk["conv1"])            # (half, half)
        wf, bb2 = _fold_bn(blk["conv2"])                 # (half, half, 3, 3)
        bw2 = jnp.transpose(wf, (2, 3, 1, 0)).reshape(9, half, half)
        blocks.append((bw1.astype(ACT_DTYPE), bb1.reshape(1, half),
                       bw2.astype(ACT_DTYPE), bb2.reshape(1, half)))

    wo, bo = _fold_bn_1x1(params["out_conv"])            # (cout, cout)
    return {
        "w_ds": w_ds, "b_ds": b_ds, "w12": w12, "b12": b12,
        "blocks": blocks,
        "wt": wo[:half].astype(ACT_DTYPE),               # out1 half of concat
        "wb": wo[half:].astype(ACT_DTYPE),               # out2 half of concat
        "bo": bo.reshape(1, cout),
    }


# ---------------------------------------------------------------------------
# CSPDarknetStage forward (Pallas path).  Returns NHWC, true channel count.
# ---------------------------------------------------------------------------
def csp_stage_forward(x_nhwc, prep):
    half = prep["wt"].shape[0]
    out1, out2 = _fused_head(x_nhwc, prep["w_ds"], prep["b_ds"],
                             prep["w12"], prep["b12"], half)
    for bw1, bb1, bw2, bb2 in prep["blocks"]:
        out2 = _darknet_block(out2, bw1, bb1, bw2, bb2)
    return _concat_out_conv(out1, out2, prep["wt"], prep["wb"], prep["bo"])


# ---------------------------------------------------------------------------
# Pure-JAX reference (for correctness check)
# ---------------------------------------------------------------------------
def _ref_cba(x, p, stride, padding):
    w_hwio = jnp.transpose(p["w"], (2, 3, 1, 0))
    y = jax.lax.conv_general_dilated(
        x, w_hwio, (stride, stride), [(padding, padding)] * 2,
        dimension_numbers=("NHWC", "HWIO", "NHWC"))
    scale = p["gamma"] / jnp.sqrt(p["var"] + BN_EPS)
    return jnp.maximum(y * scale + (p["beta"] - p["mean"] * scale), 0.0)


def csp_stage_ref(x_nhwc, params):
    out = _ref_cba(x_nhwc, params["conv"], 2, 1)
    out1 = _ref_cba(out, params["conv1"], 1, 0)
    out2 = _ref_cba(out, params["conv2"], 1, 0)
    for blk in params["blocks"]:
        mid = _ref_cba(out2, blk["conv1"], 1, 0)
        out2 = out2 + _ref_cba(mid, blk["conv2"], 1, 1)
    cat = jnp.concatenate([out1, out2], axis=-1)
    return _ref_cba(cat, params["out_conv"], 1, 0)


# ---------------------------------------------------------------------------
if __name__ == "__main__":
    key = jax.random.PRNGKey(0)
    kx, kp = jax.random.split(key)

    # PyTorch-style NCHW input: batch=2, in_channels=4, 16x16 spatial
    N, CIN, HW, COUT, NBLK = 2, 4, 16, 8, 2
    x_nchw = jax.random.normal(kx, (N, CIN, HW, HW), jnp.float32)
    params = init_stage(kp, n=NBLK, cin=CIN, cout=COUT)
    prep = prepare_stage(params)          # one-time BN fold + bf16 layout

    x_nhwc = jnp.transpose(x_nchw, (0, 2, 3, 1))
    fwd = jax.jit(csp_stage_forward)
    out = fwd(x_nhwc, prep)               # (N, H/2, W/2, COUT) bf16
    jax.block_until_ready(out)

    out_nchw = jnp.transpose(out.astype(jnp.float32), (0, 3, 1, 2))
    assert out_nchw.shape == (N, COUT, HW // 2, HW // 2)

    ref = jnp.transpose(csp_stage_ref(x_nhwc, params), (0, 3, 1, 2))
    np.testing.assert_allclose(np.asarray(out_nchw), np.asarray(ref),
                               rtol=5e-2, atol=3e-2)

    print("KERNEL_OK")
</pallas_src>

<mosaic_0001>
module attributes {stable_mosaic.version = 11 : i64} {
  func.func @kernel(%arg0: i32, %arg1: i32, %arg2: memref<1x9x9x16xbf16, #tpu.memory_space<vmem>>, %arg3: memref<4x16x8xbf16, #tpu.memory_space<vmem>>, %arg4: memref<1x8xf32, #tpu.memory_space<vmem>>, %arg5: memref<8x8xbf16, #tpu.memory_space<vmem>>, %arg6: memref<1x8xf32, #tpu.memory_space<vmem>>, %arg7: memref<1x8x8x4xbf16, #tpu.memory_space<vmem>>, %arg8: memref<1x8x8x4xbf16, #tpu.memory_space<vmem>>) attributes {dimension_semantics = [#tpu.dimension_semantics<parallel>, #tpu.dimension_semantics<parallel>], iteration_bounds = array<i64: 2, 1>, scalar_prefetch = 0 : i64, scratch_operands = 0 : i64, tpu.core_type = #tpu.core_type<tc>, window_params = [{transform_indices = @transform_0, window_bounds = array<i64: 1, 9, 9, 16>}, {pipeline_mode = #tpu.pipeline_mode<synchronous>, transform_indices = @transform_1, window_bounds = array<i64: 4, 16, 8>}, {pipeline_mode = #tpu.pipeline_mode<synchronous>, transform_indices = @transform_2, window_bounds = array<i64: 1, 8>}, {pipeline_mode = #tpu.pipeline_mode<synchronous>, transform_indices = @transform_3, window_bounds = array<i64: 8, 8>}, {pipeline_mode = #tpu.pipeline_mode<synchronous>, transform_indices = @transform_4, window_bounds = array<i64: 1, 8>}, {transform_indices = @transform_5, window_bounds = array<i64: 1, 8, 8, 4>}, {transform_indices = @transform_6, window_bounds = array<i64: 1, 8, 8, 4>}]} {
    %c0 = arith.constant 0 : index
    %c0_0 = arith.constant 0 : index
    %c0_1 = arith.constant 0 : index
    %c0_2 = arith.constant 0 : index
    %0 = vector.load %arg2[%c0, %c0_0, %c0_1, %c0_2] : memref<1x9x9x16xbf16, #tpu.memory_space<vmem>>, vector<1x9x9x16xbf16>
    %1 = vector.shape_cast %0 : vector<1x9x9x16xbf16> to vector<9x9x16xbf16>
    %cst = arith.constant 0.000000e+00 : f32
    %2 = vector.broadcast %cst : f32 to vector<64x8xf32>
    %c0_3 = arith.constant 0 : index
    %c0_4 = arith.constant 0 : index
    %3 = vector.load %arg4[%c0_3, %c0_4] : memref<1x8xf32, #tpu.memory_space<vmem>>, vector<1x8xf32>
    %4 = vector.broadcast %3 : vector<1x8xf32> to vector<64x8xf32>
    %5 = arith.addf %2, %4 : vector<64x8xf32>
    %6 = vector.extract_strided_slice %1 {offsets = [0, 0, 0], sizes = [8, 8, 16], strides = [1, 1, 1]} : vector<9x9x16xbf16> to vector<8x8x16xbf16>
    %7 = vector.shape_cast %6 : vector<8x8x16xbf16> to vector<64x16xbf16>
    %c0_5 = arith.constant 0 : index
    %c0_6 = arith.constant 0 : index
    %c0_7 = arith.constant 0 : index
    %8 = vector.load %arg3[%c0_5, %c0_6, %c0_7] : memref<4x16x8xbf16, #tpu.memory_space<vmem>>, vector<1x16x8xbf16>
    %9 = vector.shape_cast %8 : vector<1x16x8xbf16> to vector<16x8xbf16>
    %cst_8 = arith.constant dense<0.000000e+00> : vector<64x8xf32>
    %10 = tpu.matmul %7, %9, %cst_8 {dimension_numbers = #tpu.dot_dimension_numbers<[1], [0], [0], [1], [0, 0, 1, 1], [], []>} : vector<64x16xbf16>, vector<16x8xbf16>, vector<64x8xf32> -> vector<64x8xf32>
    %11 = arith.addf %5, %10 : vector<64x8xf32>
    %12 = vector.extract_strided_slice %1 {offsets = [0, 1, 0], sizes = [8, 8, 16], strides = [1, 1, 1]} : vector<9x9x16xbf16> to vector<8x8x16xbf16>
    %13 = vector.shape_cast %12 : vector<8x8x16xbf16> to vector<64x16xbf16>
    %c1 = arith.constant 1 : index
    %c0_9 = arith.constant 0 : index
    %c0_10 = arith.constant 0 : index
    %14 = vector.load %arg3[%c1, %c0_9, %c0_10] : memref<4x16x8xbf16, #tpu.memory_space<vmem>>, vector<1x16x8xbf16>
    %15 = vector.shape_cast %14 : vector<1x16x8xbf16> to vector<16x8xbf16>
    %cst_11 = arith.constant dense<0.000000e+00> : vector<64x8xf32>
    %16 = tpu.matmul %13, %15, %cst_11 {dimension_numbers = #tpu.dot_dimension_numbers<[1], [0], [0], [1], [0, 0, 1, 1], [], []>} : vector<64x16xbf16>, vector<16x8xbf16>, vector<64x8xf32> -> vector<64x8xf32>
    %17 = arith.addf %11, %16 : vector<64x8xf32>
    %18 = vector.extract_strided_slice %1 {offsets = [1, 0, 0], sizes = [8, 8, 16], strides = [1, 1, 1]} : vector<9x9x16xbf16> to vector<8x8x16xbf16>
    %19 = vector.shape_cast %18 : vector<8x8x16xbf16> to vector<64x16xbf16>
    %c2 = arith.constant 2 : index
    %c0_12 = arith.constant 0 : index
    %c0_13 = arith.constant 0 : index
    %20 = vector.load %arg3[%c2, %c0_12, %c0_13] : memref<4x16x8xbf16, #tpu.memory_space<vmem>>, vector<1x16x8xbf16>
    %21 = vector.shape_cast %20 : vector<1x16x8xbf16> to vector<16x8xbf16>
    %cst_14 = arith.constant dense<0.000000e+00> : vector<64x8xf32>
    %22 = tpu.matmul %19, %21, %cst_14 {dimension_numbers = #tpu.dot_dimension_numbers<[1], [0], [0], [1], [0, 0, 1, 1], [], []>} : vector<64x16xbf16>, vector<16x8xbf16>, vector<64x8xf32> -> vector<64x8xf32>
    %23 = arith.addf %17, %22 : vector<64x8xf32>
    %24 = vector.extract_strided_slice %1 {offsets = [1, 1, 0], sizes = [8, 8, 16], strides = [1, 1, 1]} : vector<9x9x16xbf16> to vector<8x8x16xbf16>
    %25 = vector.shape_cast %24 : vector<8x8x16xbf16> to vector<64x16xbf16>
    %c3 = arith.constant 3 : index
    %c0_15 = arith.constant 0 : index
    %c0_16 = arith.constant 0 : index
    %26 = vector.load %arg3[%c3, %c0_15, %c0_16] : memref<4x16x8xbf16, #tpu.memory_space<vmem>>, vector<1x16x8xbf16>
    %27 = vector.shape_cast %26 : vector<1x16x8xbf16> to vector<16x8xbf16>
    %cst_17 = arith.constant dense<0.000000e+00> : vector<64x8xf32>
    %28 = tpu.matmul %25, %27, %cst_17 {dimension_numbers = #tpu.dot_dimension_numbers<[1], [0], [0], [1], [0, 0, 1, 1], [], []>} : vector<64x16xbf16>, vector<16x8xbf16>, vector<64x8xf32> -> vector<64x8xf32>
    %29 = arith.addf %23, %28 : vector<64x8xf32>
    %cst_18 = arith.constant 0.000000e+00 : f32
    %30 = vector.broadcast %cst_18 : f32 to vector<64x8xf32>
    %31 = arith.maximumf %29, %30 : vector<64x8xf32>
    %32 = arith.truncf %31 : vector<64x8xf32> to vector<64x8xbf16>
    %c0_19 = arith.constant 0 : index
    %c0_20 = arith.constant 0 : index
    %33 = vector.load %arg5[%c0_19, %c0_20] : memref<8x8xbf16, #tpu.memory_space<vmem>>, vector<8x8xbf16>
    %cst_21 = arith.constant dense<0.000000e+00> : vector<64x8xf32>
    %34 = tpu.matmul %32, %33, %cst_21 {dimension_numbers = #tpu.dot_dimension_numbers<[1], [0], [0], [1], [0, 0, 1, 1], [], []>} : vector<64x8xbf16>, vector<8x8xbf16>, vector<64x8xf32> -> vector<64x8xf32>
    %c0_22 = arith.constant 0 : index
    %c0_23 = arith.constant 0 : index
    %35 = vector.load %arg6[%c0_22, %c0_23] : memref<1x8xf32, #tpu.memory_space<vmem>>, vector<1x8xf32>
    %36 = vector.broadcast %35 : vector<1x8xf32> to vector<64x8xf32>
    %37 = arith.addf %34, %36 : vector<64x8xf32>
    %cst_24 = arith.constant 0.000000e+00 : f32
    %38 = vector.broadcast %cst_24 : f32 to vector<64x8xf32>
    %39 = arith.maximumf %37, %38 : vector<64x8xf32>
    %40 = vector.extract_strided_slice %39 {offsets = [0, 0], sizes = [64, 4], strides = [1, 1]} : vector<64x8xf32> to vector<64x4xf32>
    %41 = arith.truncf %40 : vector<64x4xf32> to vector<64x4xbf16>
    %42 = vector.shape_cast %41 : vector<64x4xbf16> to vector<8x8x4xbf16>
    %c0_25 = arith.constant 0 : index
    %c0_26 = arith.constant 0 : index
    %c0_27 = arith.constant 0 : index
    %c0_28 = arith.constant 0 : index
    %43 = vector.load %arg7[%c0_25, %c0_26, %c0_27, %c0_28] : memref<1x8x8x4xbf16, #tpu.memory_space<vmem>>, vector<1x8x8x4xbf16>
    %44 = vector.shape_cast %43 : vector<1x8x8x4xbf16> to vector<8x8x4xbf16>
    %45 = vector.shape_cast %42 : vector<8x8x4xbf16> to vector<1x8x8x4xbf16>
    tpu.vector_store %arg7[%c0_25, %c0_26, %c0_27, %c0_28], %45 {strides = array<i32>} : memref<1x8x8x4xbf16, #tpu.memory_space<vmem>>, vector<1x8x8x4xbf16>,
    %46 = vector.extract_strided_slice %39 {offsets = [0, 4], sizes = [64, 4], strides = [1, 1]} : vector<64x8xf32> to vector<64x4xf32>
    %47 = arith.truncf %46 : vector<64x4xf32> to vector<64x4xbf16>
    %48 = vector.shape_cast %47 : vector<64x4xbf16> to vector<8x8x4xbf16>
    %c0_29 = arith.constant 0 : index
    %c0_30 = arith.constant 0 : index
    %c0_31 = arith.constant 0 : index
    %c0_32 = arith.constant 0 : index
    %49 = vector.load %arg8[%c0_29, %c0_30, %c0_31, %c0_32] : memref<1x8x8x4xbf16, #tpu.memory_space<vmem>>, vector<1x8x8x4xbf16>
    %50 = vector.shape_cast %49 : vector<1x8x8x4xbf16> to vector<8x8x4xbf16>
    %51 = vector.shape_cast %48 : vector<8x8x4xbf16> to vector<1x8x8x4xbf16>
    tpu.vector_store %arg8[%c0_29, %c0_30, %c0_31, %c0_32], %51 {strides = array<i32>} : memref<1x8x8x4xbf16, #tpu.memory_space<vmem>>, vector<1x8x8x4xbf16>,
    return
  }
  func.func @transform_0(%arg0: i32, %arg1: i32) -> (i32, i32, i32, i32) {
    %c1_i32 = arith.constant 1 : i32
    %0 = arith.muli %arg0, %c1_i32 : i32
    %1 = arith.addi %0, %arg1 : i32
    %c0_i32 = arith.constant 0 : i32
    %c0_i32_0 = arith.constant 0 : i32
    %c0_i32_1 = arith.constant 0 : i32
    %c0_i32_2 = arith.constant 0 : i32
    return %1, %c0_i32, %c0_i32_0, %c0_i32_1 : i32, i32, i32, i32
  }
  func.func @transform_1(%arg0: i32, %arg1: i32) -> (i32, i32, i32) {
    %c0_i32 = arith.constant 0 : i32
    %c0_i32_0 = arith.constant 0 : i32
    %c0_i32_1 = arith.constant 0 : i32
    %c0_i32_2 = arith.constant 0 : i32
    return %c0_i32, %c0_i32_0, %c0_i32_1 : i32, i32, i32
  }
  func.func @transform_2(%arg0: i32, %arg1: i32) -> (i32, i32) {
    %c0_i32 = arith.constant 0 : i32
    %c0_i32_0 = arith.constant 0 : i32
    %c0_i32_1 = arith.constant 0 : i32
    return %c0_i32, %c0_i32_0 : i32, i32
  }
  func.func @transform_3(%arg0: i32, %arg1: i32) -> (i32, i32) {
    %c0_i32 = arith.constant 0 : i32
    %c0_i32_0 = arith.constant 0 : i32
    %c0_i32_1 = arith.constant 0 : i32
    return %c0_i32, %c0_i32_0 : i32, i32
  }
  func.func @transform_4(%arg0: i32, %arg1: i32) -> (i32, i32) {
    %c0_i32 = arith.constant 0 : i32
    %c0_i32_0 = arith.constant 0 : i32
    %c0_i32_1 = arith.constant 0 : i32
    return %c0_i32, %c0_i32_0 : i32, i32
  }
  func.func @transform_5(%arg0: i32, %arg1: i32) -> (i32, i32, i32, i32) {
    %c0_i32 = arith.constant 0 : i32
    %c0_i32_0 = arith.constant 0 : i32
    %c0_i32_1 = arith.constant 0 : i32
    return %arg0, %arg1, %c0_i32, %c0_i32_0 : i32, i32, i32, i32
  }
  func.func @transform_6(%arg0: i32, %arg1: i32) -> (i32, i32, i32, i32) {
    %c0_i32 = arith.constant 0 : i32
    %c0_i32_0 = arith.constant 0 : i32
    %c0_i32_1 = arith.constant 0 : i32
    return %arg0, %arg1, %c0_i32, %c0_i32_0 : i32, i32, i32, i32
  }
}

module attributes {stable_mosaic.version = 11 : i64} {
  func.func @kernel(%arg0: i32, %arg1: memref<1x8x8x4xbf16, #tpu.memory_space<vmem>>, %arg2: memref<4x4xbf16, #tpu.memory_space<vmem>>, %arg3: memref<1x4xf32, #tpu.memory_space<vmem>>, %arg4: memref<9x4x4xbf16, #tpu.memory_space<vmem>>, %arg5: memref<1x4xf32, #tpu.memory_space<vmem>>, %arg6: memref<1x8x8x4xbf16, #tpu.memory_space<vmem>>, %arg7: memref<10x10x4xf32, #tpu.memory_space<vmem>>) attributes {dimension_semantics = [#tpu.dimension_semantics<parallel>], iteration_bounds = array<i64: 2>, scalar_prefetch = 0 : i64, scratch_operands = 1 : i64, tpu.core_type = #tpu.core_type<tc>, window_params = [{transform_indices = @transform_0, window_bounds = array<i64: 1, 8, 8, 4>}, {pipeline_mode = #tpu.pipeline_mode<synchronous>, transform_indices = @transform_1, window_bounds = array<i64: 4, 4>}, {pipeline_mode = #tpu.pipeline_mode<synchronous>, transform_indices = @transform_2, window_bounds = array<i64: 1, 4>}, {pipeline_mode = #tpu.pipeline_mode<synchronous>, transform_indices = @transform_3, window_bounds = array<i64: 9, 4, 4>}, {pipeline_mode = #tpu.pipeline_mode<synchronous>, transform_indices = @transform_4, window_bounds = array<i64: 1, 4>}, {transform_indices = @transform_5, window_bounds = array<i64: 1, 8, 8, 4>}]} {
    %c0 = arith.constant 0 : index
    %c0_0 = arith.constant 0 : index
    %c0_1 = arith.constant 0 : index
    %c0_2 = arith.constant 0 : index
    %0 = vector.load %arg1[%c0, %c0_0, %c0_1, %c0_2] : memref<1x8x8x4xbf16, #tpu.memory_space<vmem>>, vector<1x8x8x4xbf16>
    %1 = vector.shape_cast %0 : vector<1x8x8x4xbf16> to vector<8x8x4xbf16>
    %2 = vector.shape_cast %1 : vector<8x8x4xbf16> to vector<64x4xbf16>
    %c0_3 = arith.constant 0 : index
    %c0_4 = arith.constant 0 : index
    %3 = vector.load %arg2[%c0_3, %c0_4] : memref<4x4xbf16, #tpu.memory_space<vmem>>, vector<4x4xbf16>
    %cst = arith.constant dense<0.000000e+00> : vector<64x4xf32>
    %4 = tpu.matmul %2, %3, %cst {dimension_numbers = #tpu.dot_dimension_numbers<[1], [0], [0], [1], [0, 0, 1, 1], [], []>} : vector<64x4xbf16>, vector<4x4xbf16>, vector<64x4xf32> -> vector<64x4xf32>
    %c0_5 = arith.constant 0 : index
    %c0_6 = arith.constant 0 : index
    %5 = vector.load %arg3[%c0_5, %c0_6] : memref<1x4xf32, #tpu.memory_space<vmem>>, vector<1x4xf32>
    %6 = vector.broadcast %5 : vector<1x4xf32> to vector<64x4xf32>
    %7 = arith.addf %4, %6 : vector<64x4xf32>
    %cst_7 = arith.constant 0.000000e+00 : f32
    %8 = vector.broadcast %cst_7 : f32 to vector<64x4xf32>
    %9 = arith.maximumf %7, %8 : vector<64x4xf32>
    %cst_8 = arith.constant 0.000000e+00 : f32
    %10 = vector.broadcast %cst_8 : f32 to vector<1x10x4xf32>
    %c0_9 = arith.constant 0 : index
    %c0_10 = arith.constant 0 : index
    %c0_11 = arith.constant 0 : index
    %11 = vector.load %arg7[%c0_9, %c0_10, %c0_11] : memref<10x10x4xf32, #tpu.memory_space<vmem>>, vector<1x10x4xf32>
    tpu.vector_store %arg7[%c0_9, %c0_10, %c0_11], %10 {strides = array<i32>} : memref<10x10x4xf32, #tpu.memory_space<vmem>>, vector<1x10x4xf32>,
    %cst_12 = arith.constant 0.000000e+00 : f32
    %12 = vector.broadcast %cst_12 : f32 to vector<1x10x4xf32>
    %c9 = arith.constant 9 : index
    %c0_13 = arith.constant 0 : index
    %c0_14 = arith.constant 0 : index
    %13 = vector.load %arg7[%c9, %c0_13, %c0_14] : memref<10x10x4xf32, #tpu.memory_space<vmem>>, vector<1x10x4xf32>
    tpu.vector_store %arg7[%c9, %c0_13, %c0_14], %12 {strides = array<i32>} : memref<10x10x4xf32, #tpu.memory_space<vmem>>, vector<1x10x4xf32>,
    %cst_15 = arith.constant 0.000000e+00 : f32
    %14 = vector.broadcast %cst_15 : f32 to vector<10x1x4xf32>
    %c0_16 = arith.constant 0 : index
    %c0_17 = arith.constant 0 : index
    %c0_18 = arith.constant 0 : index
    %15 = vector.load %arg7[%c0_16, %c0_17, %c0_18] : memref<10x10x4xf32, #tpu.memory_space<vmem>>, vector<10x1x4xf32>
    tpu.vector_store %arg7[%c0_16, %c0_17, %c0_18], %14 {strides = array<i32>} : memref<10x10x4xf32, #tpu.memory_space<vmem>>, vector<10x1x4xf32>,
    %cst_19 = arith.constant 0.000000e+00 : f32
    %16 = vector.broadcast %cst_19 : f32 to vector<10x1x4xf32>
    %c0_20 = arith.constant 0 : index
    %c9_21 = arith.constant 9 : index
    %c0_22 = arith.constant 0 : index
    %17 = vector.load %arg7[%c0_20, %c9_21, %c0_22] : memref<10x10x4xf32, #tpu.memory_space<vmem>>, vector<10x1x4xf32>
    tpu.vector_store %arg7[%c0_20, %c9_21, %c0_22], %16 {strides = array<i32>} : memref<10x10x4xf32, #tpu.memory_space<vmem>>, vector<10x1x4xf32>,
    %18 = vector.shape_cast %9 : vector<64x4xf32> to vector<8x8x4xf32>
    %c1 = arith.constant 1 : index
    %c1_23 = arith.constant 1 : index
    %c0_24 = arith.constant 0 : index
    %19 = vector.load %arg7[%c1, %c1_23, %c0_24] : memref<10x10x4xf32, #tpu.memory_space<vmem>>, vector<8x8x4xf32>
    tpu.vector_store %arg7[%c1, %c1_23, %c0_24], %18 {strides = array<i32>} : memref<10x10x4xf32, #tpu.memory_space<vmem>>, vector<8x8x4xf32>,
    %cst_25 = arith.constant 0.000000e+00 : f32
    %20 = vector.broadcast %cst_25 : f32 to vector<64x4xf32>
    %c0_26 = arith.constant 0 : index
    %c0_27 = arith.constant 0 : index
    %21 = vector.load %arg5[%c0_26, %c0_27] : memref<1x4xf32, #tpu.memory_space<vmem>>, vector<1x4xf32>
    %22 = vector.broadcast %21 : vector<1x4xf32> to vector<64x4xf32>
    %23 = arith.addf %20, %22 : vector<64x4xf32>
    %c0_28 = arith.constant 0 : index
    %c0_29 = arith.constant 0 : index
    %c0_30 = arith.constant 0 : index
    %24 = vector.load %arg7[%c0_28, %c0_29, %c0_30] : memref<10x10x4xf32, #tpu.memory_space<vmem>>, vector<8x8x4xf32>
    %25 = vector.shape_cast %24 : vector<8x8x4xf32> to vector<64x4xf32>
    %26 = arith.truncf %25 : vector<64x4xf32> to vector<64x4xbf16>
    %c0_31 = arith.constant 0 : index
    %c0_32 = arith.constant 0 : index
    %c0_33 = arith.constant 0 : index
    %27 = vector.load %arg4[%c0_31, %c0_32, %c0_33] : memref<9x4x4xbf16, #tpu.memory_space<vmem>>, vector<1x4x4xbf16>
    %28 = vector.shape_cast %27 : vector<1x4x4xbf16> to vector<4x4xbf16>
    %cst_34 = arith.constant dense<0.000000e+00> : vector<64x4xf32>
    %29 = tpu.matmul %26, %28, %cst_34 {dimension_numbers = #tpu.dot_dimension_numbers<[1], [0], [0], [1], [0, 0, 1, 1], [], []>} : vector<64x4xbf16>, vector<4x4xbf16>, vector<64x4xf32> -> vector<64x4xf32>
    %30 = arith.addf %23, %29 : vector<64x4xf32>
    %c0_35 = arith.constant 0 : index
    %c1_36 = arith.constant 1 : index
    %c0_37 = arith.constant 0 : index
    %31 = vector.load %arg7[%c0_35, %c1_36, %c0_37] : memref<10x10x4xf32, #tpu.memory_space<vmem>>, vector<8x8x4xf32>
    %32 = vector.shape_cast %31 : vector<8x8x4xf32> to vector<64x4xf32>
    %33 = arith.truncf %32 : vector<64x4xf32> to vector<64x4xbf16>
    %c1_38 = arith.constant 1 : index
    %c0_39 = arith.constant 0 : index
    %c0_40 = arith.constant 0 : index
    %34 = vector.load %arg4[%c1_38, %c0_39, %c0_40] : memref<9x4x4xbf16, #tpu.memory_space<vmem>>, vector<1x4x4xbf16>
    %35 = vector.shape_cast %34 : vector<1x4x4xbf16> to vector<4x4xbf16>
    %cst_41 = arith.constant dense<0.000000e+00> : vector<64x4xf32>
    %36 = tpu.matmul %33, %35, %cst_41 {dimension_numbers = #tpu.dot_dimension_numbers<[1], [0], [0], [1], [0, 0, 1, 1], [], []>} : vector<64x4xbf16>, vector<4x4xbf16>, vector<64x4xf32> -> vector<64x4xf32>
    %37 = arith.addf %30, %36 : vector<64x4xf32>
    %c0_42 = arith.constant 0 : index
    %c2 = arith.constant 2 : index
    %c0_43 = arith.constant 0 : index
    %38 = vector.load %arg7[%c0_42, %c2, %c0_43] : memref<10x10x4xf32, #tpu.memory_space<vmem>>, vector<8x8x4xf32>
    %39 = vector.shape_cast %38 : vector<8x8x4xf32> to vector<64x4xf32>
    %40 = arith.truncf %39 : vector<64x4xf32> to vector<64x4xbf16>
    %c2_44 = arith.constant 2 : index
    %c0_45 = arith.constant 0 : index
    %c0_46 = arith.constant 0 : index
    %41 = vector.load %arg4[%c2_44, %c0_45, %c0_46] : memref<9x4x4xbf16, #tpu.memory_space<vmem>>, vector<1x4x4xbf16>
    %42 = vector.shape_cast %41 : vector<1x4x4xbf16> to vector<4x4xbf16>
    %cst_47 = arith.constant dense<0.000000e+00> : vector<64x4xf32>
    %43 = tpu.matmul %40, %42, %cst_47 {dimension_numbers = #tpu.dot_dimension_numbers<[1], [0], [0], [1], [0, 0, 1, 1], [], []>} : vector<64x4xbf16>, vector<4x4xbf16>, vector<64x4xf32> -> vector<64x4xf32>
    %44 = arith.addf %37, %43 : vector<64x4xf32>
    %c1_48 = arith.constant 1 : index
    %c0_49 = arith.constant 0 : index
    %c0_50 = arith.constant 0 : index
    %45 = vector.load %arg7[%c1_48, %c0_49, %c0_50] : memref<10x10x4xf32, #tpu.memory_space<vmem>>, vector<8x8x4xf32>
    %46 = vector.shape_cast %45 : vector<8x8x4xf32> to vector<64x4xf32>
    %47 = arith.truncf %46 : vector<64x4xf32> to vector<64x4xbf16>
    %c3 = arith.constant 3 : index
    %c0_51 = arith.constant 0 : index
    %c0_52 = arith.constant 0 : index
    %48 = vector.load %arg4[%c3, %c0_51, %c0_52] : memref<9x4x4xbf16, #tpu.memory_space<vmem>>, vector<1x4x4xbf16>
    %49 = vector.shape_cast %48 : vector<1x4x4xbf16> to vector<4x4xbf16>
    %cst_53 = arith.constant dense<0.000000e+00> : vector<64x4xf32>
    %50 = tpu.matmul %47, %49, %cst_53 {dimension_numbers = #tpu.dot_dimension_numbers<[1], [0], [0], [1], [0, 0, 1, 1], [], []>} : vector<64x4xbf16>, vector<4x4xbf16>, vector<64x4xf32> -> vector<64x4xf32>
    %51 = arith.addf %44, %50 : vector<64x4xf32>
    %c1_54 = arith.constant 1 : index
    %c1_55 = arith.constant 1 : index
    %c0_56 = arith.constant 0 : index
    %52 = vector.load %arg7[%c1_54, %c1_55, %c0_56] : memref<10x10x4xf32, #tpu.memory_space<vmem>>, vector<8x8x4xf32>
    %53 = vector.shape_cast %52 : vector<8x8x4xf32> to vector<64x4xf32>
    %54 = arith.truncf %53 : vector<64x4xf32> to vector<64x4xbf16>
    %c4 = arith.constant 4 : index
    %c0_57 = arith.constant 0 : index
    %c0_58 = arith.constant 0 : index
    %55 = vector.load %arg4[%c4, %c0_57, %c0_58] : memref<9x4x4xbf16, #tpu.memory_space<vmem>>, vector<1x4x4xbf16>
    %56 = vector.shape_cast %55 : vector<1x4x4xbf16> to vector<4x4xbf16>
    %cst_59 = arith.constant dense<0.000000e+00> : vector<64x4xf32>
    %57 = tpu.matmul %54, %56, %cst_59 {dimension_numbers = #tpu.dot_dimension_numbers<[1], [0], [0], [1], [0, 0, 1, 1], [], []>} : vector<64x4xbf16>, vector<4x4xbf16>, vector<64x4xf32> -> vector<64x4xf32>
    %58 = arith.addf %51, %57 : vector<64x4xf32>
    %c1_60 = arith.constant 1 : index
    %c2_61 = arith.constant 2 : index
    %c0_62 = arith.constant 0 : index
    %59 = vector.load %arg7[%c1_60, %c2_61, %c0_62] : memref<10x10x4xf32, #tpu.memory_space<vmem>>, vector<8x8x4xf32>
    %60 = vector.shape_cast %59 : vector<8x8x4xf32> to vector<64x4xf32>
    %61 = arith.truncf %60 : vector<64x4xf32> to vector<64x4xbf16>
    %c5 = arith.constant 5 : index
    %c0_63 = arith.constant 0 : index
    %c0_64 = arith.constant 0 : index
    %62 = vector.load %arg4[%c5, %c0_63, %c0_64] : memref<9x4x4xbf16, #tpu.memory_space<vmem>>, vector<1x4x4xbf16>
    %63 = vector.shape_cast %62 : vector<1x4x4xbf16> to vector<4x4xbf16>
    %cst_65 = arith.constant dense<0.000000e+00> : vector<64x4xf32>
    %64 = tpu.matmul %61, %63, %cst_65 {dimension_numbers = #tpu.dot_dimension_numbers<[1], [0], [0], [1], [0, 0, 1, 1], [], []>} : vector<64x4xbf16>, vector<4x4xbf16>, vector<64x4xf32> -> vector<64x4xf32>
    %65 = arith.addf %58, %64 : vector<64x4xf32>
    %c2_66 = arith.constant 2 : index
    %c0_67 = arith.constant 0 : index
    %c0_68 = arith.constant 0 : index
    %66 = vector.load %arg7[%c2_66, %c0_67, %c0_68] : memref<10x10x4xf32, #tpu.memory_space<vmem>>, vector<8x8x4xf32>
    %67 = vector.shape_cast %66 : vector<8x8x4xf32> to vector<64x4xf32>
    %68 = arith.truncf %67 : vector<64x4xf32> to vector<64x4xbf16>
    %c6 = arith.constant 6 : index
    %c0_69 = arith.constant 0 : index
    %c0_70 = arith.constant 0 : index
    %69 = vector.load %arg4[%c6, %c0_69, %c0_70] : memref<9x4x4xbf16, #tpu.memory_space<vmem>>, vector<1x4x4xbf16>
    %70 = vector.shape_cast %69 : vector<1x4x4xbf16> to vector<4x4xbf16>
    %cst_71 = arith.constant dense<0.000000e+00> : vector<64x4xf32>
    %71 = tpu.matmul %68, %70, %cst_71 {dimension_numbers = #tpu.dot_dimension_numbers<[1], [0], [0], [1], [0, 0, 1, 1], [], []>} : vector<64x4xbf16>, vector<4x4xbf16>, vector<64x4xf32> -> vector<64x4xf32>
    %72 = arith.addf %65, %71 : vector<64x4xf32>
    %c2_72 = arith.constant 2 : index
    %c1_73 = arith.constant 1 : index
    %c0_74 = arith.constant 0 : index
    %73 = vector.load %arg7[%c2_72, %c1_73, %c0_74] : memref<10x10x4xf32, #tpu.memory_space<vmem>>, vector<8x8x4xf32>
    %74 = vector.shape_cast %73 : vector<8x8x4xf32> to vector<64x4xf32>
    %75 = arith.truncf %74 : vector<64x4xf32> to vector<64x4xbf16>
    %c7 = arith.constant 7 : index
    %c0_75 = arith.constant 0 : index
    %c0_76 = arith.constant 0 : index
    %76 = vector.load %arg4[%c7, %c0_75, %c0_76] : memref<9x4x4xbf16, #tpu.memory_space<vmem>>, vector<1x4x4xbf16>
    %77 = vector.shape_cast %76 : vector<1x4x4xbf16> to vector<4x4xbf16>
    %cst_77 = arith.constant dense<0.000000e+00> : vector<64x4xf32>
    %78 = tpu.matmul %75, %77, %cst_77 {dimension_numbers = #tpu.dot_dimension_numbers<[1], [0], [0], [1], [0, 0, 1, 1], [], []>} : vector<64x4xbf16>, vector<4x4xbf16>, vector<64x4xf32> -> vector<64x4xf32>
    %79 = arith.addf %72, %78 : vector<64x4xf32>
    %c2_78 = arith.constant 2 : index
    %c2_79 = arith.constant 2 : index
    %c0_80 = arith.constant 0 : index
    %80 = vector.load %arg7[%c2_78, %c2_79, %c0_80] : memref<10x10x4xf32, #tpu.memory_space<vmem>>, vector<8x8x4xf32>
    %81 = vector.shape_cast %80 : vector<8x8x4xf32> to vector<64x4xf32>
    %82 = arith.truncf %81 : vector<64x4xf32> to vector<64x4xbf16>
    %c8 = arith.constant 8 : index
    %c0_81 = arith.constant 0 : index
    %c0_82 = arith.constant 0 : index
    %83 = vector.load %arg4[%c8, %c0_81, %c0_82] : memref<9x4x4xbf16, #tpu.memory_space<vmem>>, vector<1x4x4xbf16>
    %84 = vector.shape_cast %83 : vector<1x4x4xbf16> to vector<4x4xbf16>
    %cst_83 = arith.constant dense<0.000000e+00> : vector<64x4xf32>
    %85 = tpu.matmul %82, %84, %cst_83 {dimension_numbers = #tpu.dot_dimension_numbers<[1], [0], [0], [1], [0, 0, 1, 1], [], []>} : vector<64x4xbf16>, vector<4x4xbf16>, vector<64x4xf32> -> vector<64x4xf32>
    %86 = arith.addf %79, %85 : vector<64x4xf32>
    %cst_84 = arith.constant 0.000000e+00 : f32
    %87 = vector.broadcast %cst_84 : f32 to vector<64x4xf32>
    %88 = arith.maximumf %86, %87 : vector<64x4xf32>
    %89 = arith.extf %2 : vector<64x4xbf16> to vector<64x4xf32>
    %90 = arith.addf %89, %88 : vector<64x4xf32>
    %91 = arith.truncf %90 : vector<64x4xf32> to vector<64x4xbf16>
    %92 = vector.shape_cast %91 : vector<64x4xbf16> to vector<8x8x4xbf16>
    %c0_85 = arith.constant 0 : index
    %c0_86 = arith.constant 0 : index
    %c0_87 = arith.constant 0 : index
    %c0_88 = arith.constant 0 : index
    %93 = vector.load %arg6[%c0_85, %c0_86, %c0_87, %c0_88] : memref<1x8x8x4xbf16, #tpu.memory_space<vmem>>, vector<1x8x8x4xbf16>
    %94 = vector.shape_cast %93 : vector<1x8x8x4xbf16> to vector<8x8x4xbf16>
    %95 = vector.shape_cast %92 : vector<8x8x4xbf16> to vector<1x8x8x4xbf16>
    tpu.vector_store %arg6[%c0_85, %c0_86, %c0_87, %c0_88], %95 {strides = array<i32>} : memref<1x8x8x4xbf16, #tpu.memory_space<vmem>>, vector<1x8x8x4xbf16>,
    return
  }
  func.func @transform_0(%arg0: i32) -> (i32, i32, i32, i32) {
    %c0_i32 = arith.constant 0 : i32
    %c0_i32_0 = arith.constant 0 : i32
    %c0_i32_1 = arith.constant 0 : i32
    %c0_i32_2 = arith.constant 0 : i32
    return %arg0, %c0_i32, %c0_i32_0, %c0_i32_1 : i32, i32, i32, i32
  }
  func.func @transform_1(%arg0: i32) -> (i32, i32) {
    %c0_i32 = arith.constant 0 : i32
    %c0_i32_0 = arith.constant 0 : i32
    %c0_i32_1 = arith.constant 0 : i32
    return %c0_i32, %c0_i32_0 : i32, i32
  }
  func.func @transform_2(%arg0: i32) -> (i32, i32) {
    %c0_i32 = arith.constant 0 : i32
    %c0_i32_0 = arith.constant 0 : i32
    %c0_i32_1 = arith.constant 0 : i32
    return %c0_i32, %c0_i32_0 : i32, i32
  }
  func.func @transform_3(%arg0: i32) -> (i32, i32, i32) {
    %c0_i32 = arith.constant 0 : i32
    %c0_i32_0 = arith.constant 0 : i32
    %c0_i32_1 = arith.constant 0 : i32
    %c0_i32_2 = arith.constant 0 : i32
    return %c0_i32, %c0_i32_0, %c0_i32_1 : i32, i32, i32
  }
  func.func @transform_4(%arg0: i32) -> (i32, i32) {
    %c0_i32 = arith.constant 0 : i32
    %c0_i32_0 = arith.constant 0 : i32
    %c0_i32_1 = arith.constant 0 : i32
    return %c0_i32, %c0_i32_0 : i32, i32
  }
  func.func @transform_5(%arg0: i32) -> (i32, i32, i32, i32) {
    %c0_i32 = arith.constant 0 : i32
    %c0_i32_0 = arith.constant 0 : i32
    %c0_i32_1 = arith.constant 0 : i32
    %c0_i32_2 = arith.constant 0 : i32
    return %arg0, %c0_i32, %c0_i32_0, %c0_i32_1 : i32, i32, i32, i32
  }
}

module attributes {stable_mosaic.version = 11 : i64} {
  func.func @kernel(%arg0: i32, %arg1: i32, %arg2: memref<1x8x8x4xbf16, #tpu.memory_space<vmem>>, %arg3: memref<1x8x8x4xbf16, #tpu.memory_space<vmem>>, %arg4: memref<4x8xbf16, #tpu.memory_space<vmem>>, %arg5: memref<4x8xbf16, #tpu.memory_space<vmem>>, %arg6: memref<1x8xf32, #tpu.memory_space<vmem>>, %arg7: memref<1x8x8x8xbf16, #tpu.memory_space<vmem>>) attributes {dimension_semantics = [#tpu.dimension_semantics<parallel>, #tpu.dimension_semantics<parallel>], iteration_bounds = array<i64: 2, 1>, scalar_prefetch = 0 : i64, scratch_operands = 0 : i64, tpu.core_type = #tpu.core_type<tc>, window_params = [{transform_indices = @transform_0, window_bounds = array<i64: 1, 8, 8, 4>}, {transform_indices = @transform_1, window_bounds = array<i64: 1, 8, 8, 4>}, {pipeline_mode = #tpu.pipeline_mode<synchronous>, transform_indices = @transform_2, window_bounds = array<i64: 4, 8>}, {pipeline_mode = #tpu.pipeline_mode<synchronous>, transform_indices = @transform_3, window_bounds = array<i64: 4, 8>}, {pipeline_mode = #tpu.pipeline_mode<synchronous>, transform_indices = @transform_4, window_bounds = array<i64: 1, 8>}, {transform_indices = @transform_5, window_bounds = array<i64: 1, 8, 8, 8>}]} {
    %c0 = arith.constant 0 : index
    %c0_0 = arith.constant 0 : index
    %c0_1 = arith.constant 0 : index
    %c0_2 = arith.constant 0 : index
    %0 = vector.load %arg2[%c0, %c0_0, %c0_1, %c0_2] : memref<1x8x8x4xbf16, #tpu.memory_space<vmem>>, vector<1x8x8x4xbf16>
    %1 = vector.shape_cast %0 : vector<1x8x8x4xbf16> to vector<8x8x4xbf16>
    %2 = vector.shape_cast %1 : vector<8x8x4xbf16> to vector<64x4xbf16>
    %c0_3 = arith.constant 0 : index
    %c0_4 = arith.constant 0 : index
    %c0_5 = arith.constant 0 : index
    %c0_6 = arith.constant 0 : index
    %3 = vector.load %arg3[%c0_3, %c0_4, %c0_5, %c0_6] : memref<1x8x8x4xbf16, #tpu.memory_space<vmem>>, vector<1x8x8x4xbf16>
    %4 = vector.shape_cast %3 : vector<1x8x8x4xbf16> to vector<8x8x4xbf16>
    %5 = vector.shape_cast %4 : vector<8x8x4xbf16> to vector<64x4xbf16>
    %c0_7 = arith.constant 0 : index
    %c0_8 = arith.constant 0 : index
    %6 = vector.load %arg4[%c0_7, %c0_8] : memref<4x8xbf16, #tpu.memory_space<vmem>>, vector<4x8xbf16>
    %cst = arith.constant dense<0.000000e+00> : vector<64x8xf32>
    %7 = tpu.matmul %2, %6, %cst {dimension_numbers = #tpu.dot_dimension_numbers<[1], [0], [0], [1], [0, 0, 1, 1], [], []>} : vector<64x4xbf16>, vector<4x8xbf16>, vector<64x8xf32> -> vector<64x8xf32>
    %c0_9 = arith.constant 0 : index
    %c0_10 = arith.constant 0 : index
    %8 = vector.load %arg5[%c0_9, %c0_10] : memref<4x8xbf16, #tpu.memory_space<vmem>>, vector<4x8xbf16>
    %cst_11 = arith.constant dense<0.000000e+00> : vector<64x8xf32>
    %9 = tpu.matmul %5, %8, %cst_11 {dimension_numbers = #tpu.dot_dimension_numbers<[1], [0], [0], [1], [0, 0, 1, 1], [], []>} : vector<64x4xbf16>, vector<4x8xbf16>, vector<64x8xf32> -> vector<64x8xf32>
    %10 = arith.addf %7, %9 : vector<64x8xf32>
    %c0_12 = arith.constant 0 : index
    %c0_13 = arith.constant 0 : index
    %11 = vector.load %arg6[%c0_12, %c0_13] : memref<1x8xf32, #tpu.memory_space<vmem>>, vector<1x8xf32>
    %12 = vector.broadcast %11 : vector<1x8xf32> to vector<64x8xf32>
    %13 = arith.addf %10, %12 : vector<64x8xf32>
    %cst_14 = arith.constant 0.000000e+00 : f32
    %14 = vector.broadcast %cst_14 : f32 to vector<64x8xf32>
    %15 = arith.maximumf %13, %14 : vector<64x8xf32>
    %16 = arith.truncf %15 : vector<64x8xf32> to vector<64x8xbf16>
    %17 = vector.shape_cast %16 : vector<64x8xbf16> to vector<8x8x8xbf16>
    %c0_15 = arith.constant 0 : index
    %c0_16 = arith.constant 0 : index
    %c0_17 = arith.constant 0 : index
    %c0_18 = arith.constant 0 : index
    %18 = vector.load %arg7[%c0_15, %c0_16, %c0_17, %c0_18] : memref<1x8x8x8xbf16, #tpu.memory_space<vmem>>, vector<1x8x8x8xbf16>
    %19 = vector.shape_cast %18 : vector<1x8x8x8xbf16> to vector<8x8x8xbf16>
    %20 = vector.shape_cast %17 : vector<8x8x8xbf16> to vector<1x8x8x8xbf16>
    tpu.vector_store %arg7[%c0_15, %c0_16, %c0_17, %c0_18], %20 {strides = array<i32>} : memref<1x8x8x8xbf16, #tpu.memory_space<vmem>>, vector<1x8x8x8xbf16>,
    return
  }
  func.func @transform_0(%arg0: i32, %arg1: i32) -> (i32, i32, i32, i32) {
    %c0_i32 = arith.constant 0 : i32
    %c0_i32_0 = arith.constant 0 : i32
    %c0_i32_1 = arith.constant 0 : i32
    return %arg0, %arg1, %c0_i32, %c0_i32_0 : i32, i32, i32, i32
  }
  func.func @transform_1(%arg0: i32, %arg1: i32) -> (i32, i32, i32, i32) {
    %c0_i32 = arith.constant 0 : i32
    %c0_i32_0 = arith.constant 0 : i32
    %c0_i32_1 = arith.constant 0 : i32
    return %arg0, %arg1, %c0_i32, %c0_i32_0 : i32, i32, i32, i32
  }
  func.func @transform_2(%arg0: i32, %arg1: i32) -> (i32, i32) {
    %c0_i32 = arith.constant 0 : i32
    %c0_i32_0 = arith.constant 0 : i32
    %c0_i32_1 = arith.constant 0 : i32
    return %c0_i32, %c0_i32_0 : i32, i32
  }
  func.func @transform_3(%arg0: i32, %arg1: i32) -> (i32, i32) {
    %c0_i32 = arith.constant 0 : i32
    %c0_i32_0 = arith.constant 0 : i32
    %c0_i32_1 = arith.constant 0 : i32
    return %c0_i32, %c0_i32_0 : i32, i32
  }
  func.func @transform_4(%arg0: i32, %arg1: i32) -> (i32, i32) {
    %c0_i32 = arith.constant 0 : i32
    %c0_i32_0 = arith.constant 0 : i32
    %c0_i32_1 = arith.constant 0 : i32
    return %c0_i32, %c0_i32_0 : i32, i32
  }
  func.func @transform_5(%arg0: i32, %arg1: i32) -> (i32, i32, i32, i32) {
    %c0_i32 = arith.constant 0 : i32
    %c0_i32_0 = arith.constant 0 : i32
    %c0_i32_1 = arith.constant 0 : i32
    return %arg0, %arg1, %c0_i32, %c0_i32_0 : i32, i32, i32, i32
  }
}

</mosaic_0001>

<bundles_post_ra>
// kernel: csp_stage_forward.7
= control target key start
LH: loop header
LB: loop body
LE: loop exit
PB: predicated region body
PF: predicated region fallthrough
CT: control target
= control target key end

     0   :  { %10 = vsyncpa [#allocation3], 0  ;;  %s1115_s0 = inlined_call_operand.vmem [shape: bf16[2,8,8,4], index: 0, kind: input, shape index: {}]   ;;  %s1116_s1 = inlined_call_operand.vmem [shape: bf16[2,8,8,4], index: 1, kind: input, shape index: {}]   ;;  %s1117_s2 = inlined_call_operand.vmem [shape: bf16[4,8], index: 2, kind: input, shape index: {}]   ;;  %s1118_s3 = inlined_call_operand.vmem [shape: bf16[4,8], index: 3, kind: input, shape index: {}]   ;;  %s1119_s4 = inlined_call_operand.vmem [shape: f32[1,8], index: 4, kind: input, shape index: {}]   ;;  %s1120_s5 = inlined_call_operand.hbm [shape: bf16[2,8,8,8], index: 5, kind: output, shape index: {}]  }
   0x1   :  { %12 = vsyncpa [#allocation3 + $0x1], 0  ;;  %s957_s18 = smov 0   ;;  %s959_s19 = smov 0  }
   0x2   :  { %s961_s20 = smov 0   ;;  %s963_s21 = smov 0  }
   0x3   :  { %s965_s22 = smov 0   ;;  %s967_s23 = smov 0  }
   0x4 LB: > { %s688_s24 = sadd.s32 4294967295, %s922_s23   ;;  %s689_s25 = sadd.s32 4294967294, %s922_s23   ;;  %s922_s23 = sphi %s967_s23, %s18_s23   ;;  %s918_s22 = sphi %s965_s22, %s1127_s22   ;;  %s914_s21 = sphi %s963_s21, %s1126_s21   ;;  %s910_s20 = sphi %s961_s20, %s1125_s20   ;;  %s906_s19 = sphi %s959_s19, %s1124_s19   ;;  %s902_s18 = sphi %s957_s18, %s1123_s18  }
   0x5   : > { %s30_s26 = sadd.s32 1, %s918_s22  ;;  %s158_s27 = sadd.s32 1, %s910_s20 }
   0x6   : > { %p32_p0 = scmp.ge.s32.totalorder %s30_s26, 2  ;;  %p168_p1 = scmp.ne.s32.totalorder %s910_s20, %s906_s19 }
   0x7   : > { %p169_p2 = scmp.eq.s32.totalorder %s688_s24, 1  ;;  %p174_p3 = scmp.ne.s32.totalorder %s906_s19, %s902_s18 }
   0x8   : > { %s1129_s26 = smov (%p32_p0, %s30_s26), 0  ;;  %p175_p5 = scmp.eq.s32.totalorder %s689_s25, 1 }
   0x9   : > { %p997_p4 = por %p169_p2, %p168_p1  ;;  %s153_s29 = ssub.s32 %s918_s22, %s1129_s26 }
   0xa   : > { %p692_p6 = scmp.ge.s32.totalorder %s922_s23, 1  ;;  %p156_p7 = scmp.eq.s32.totalorder %s153_s29, 0 }
   0xb   : > { %p1004_p8 = por %p175_p5, %p174_p3  ;;  %p228_p9 = scmp.lt.s32.totalorder %s922_s23, 3 }
   0xc   : > { %s1010_s6 = scalar_select %p156_p7, %s910_s20, %s158_s27  }
   0xd   : > { %p229_p10 = pnand %p692_p6, %p228_p9 }
   0xe   : > { %v308_v0 = vld [vmem:[%s1118_s3] sm:$0x3] (!%p229_p10)  ;;  %vm342_vm0 = vcmask (!%p229_p10), 1041408   ;;  %p270_p11 = scmp.lt.s32.totalorder (!%p229_p10), %s914_s21, 1  ;;  %vm329_vm1 = vcmask (!%p229_p10), 31744   ;;  %s266_s25 = sand.u32 (!%p229_p10), 1, %s906_s19  }
   0xf   : > { %232 = sbr.rel (%p229_p10) target bundleno = 275 (0x113), region = 40  ;;  %v307_v1 = vld [vmem:[%s1117_s2] sm:$0x3] (!%p229_p10)  ;;  %777 = vmatprep.subr.msk.bf16.mxu1 (!%p229_p10), %vm342_vm0, %v308_v0  ;;  %v344_v2 = vsel (!%p229_p10), %vm342_vm0, %v308_v0, 0  ;;  %s693_s7 = sshll.u32 (!%p229_p10), %s266_s25, 5  ;;  %vm566_vm2 = vcmask (!%p229_p10), 60416  }
  0x10   : > { %778 = vmatprep.subr.msk.bf16.mxu0 (!%p229_p10), %vm342_vm0, %v307_v1  ;;  %v444_v3 = vsel (!%p229_p10), %vm342_vm0, %v307_v1, 0  ;;  %750 = vmatpush3.bf16.msra.mxu1 (!%p229_p10), %v344_v2  ;;  %v714_v14 = vld [vmem:[%s1119_s4] ss:$0 sm:$0xff] (!%p229_p10)  ;;  %s1040_s8 = scalar_lea.vmem (!%p229_p10), [#allocation2], %s693_s7  ;;  %s738_s9 = sshll.u32 (!%p229_p10), %s914_s21, 9 }
  0x11   : > { %760 = vmatpush3.bf16.msra.mxu0 (!%p229_p10), %v444_v3  ;;  %s591_s10 = sshll.u32 (!%p229_p10), %s1040_s8, 4  ;;  %s1057_s13 = scalar_lea.hbm (!%p229_p10), %s1120_s5, %s738_s9  ;;  %s1059_s10 = int_to_ptr.vmem [resolvable:$true] %s591_s10 }
  0x12   : > { %s844_s14 = scalar_lea.vmem (!%p229_p10), %s1059_s10, 512 }
  0x13   : > { %p845_p12 = scmp.ne.s32.totalorder (!%p229_p10), %s1059_s10, %s844_s14 }
  0x15   : > { %p846_p13 = pnand (!%p229_p10), %p845_p12, %p997_p4 }
  0x16   : > { %s271_s11 = scalar_select %p270_p11, %s914_s21, 1 }
  0x17   : > { %s1069_s21 = scalar_lea.sflag [#allocation3], %s266_s25  ;;  %p847_p0 = pneg %p846_p13 }
  0x18   : > { %s728_s12 = sshll.u32 %s271_s11, 5 }
  0x19   : > { %s287_s15 = scalar_lea.vmem %s1116_s1, %s728_s12  ;;  %s277_s24 = scalar_lea.vmem %s1115_s0, %s728_s12 }
  0x1a   : > { %v836_v4 = vld [vmem:[%s287_s15] sm:$0xff]   ;;  %v838_v6 = vld [vmem:[%s287_s15 + $0x8] sm:$0xff]   ;;  %v840_v8 = vld [vmem:[%s287_s15 + $0x10] sm:$0xff]  }
  0x1b   : > { %v837_v5 = vld [vmem:[%s277_s24] sm:$0xff]   ;;  %751 = vmatprep.mubr.msk.bf16.mxu1 %vm329_vm1, %v836_v4  ;;  %v839_v7 = vld [vmem:[%s277_s24 + $0x8] sm:$0xff]   ;;  %v841_v9 = vld [vmem:[%s277_s24 + $0x10] sm:$0xff]  }
  0x1c   : > { %761 = vmatprep.mubr.msk.bf16.mxu0 %vm329_vm1, %v837_v5  ;;  %752 = vmatmul.mubr.msk.bf16.vlgmr.msra.gmra.mrb[0].mxu1 %vm329_vm1, %v838_v6  ;;  %v842_v10 = vld [vmem:[%s287_s15 + $0x18] sm:$0xff]   ;;  %s924_s15 = smov [#allocation2]  }
  0x1d   : > { %762 = vmatmul.mubr.msk.bf16.vlgmr.msra.gmra.mrb[0].mxu0 %vm329_vm1, %v839_v7  ;;  %755 = vmatprep.mubr.msk.bf16.mxu1 %vm329_vm1, %v840_v8  ;;  %v843_v11 = vld [vmem:[%s277_s24 + $0x18] sm:$0xff]   ;;  %s848_s16 = sshll.u32 %s924_s15, 4  ;;  %s849_s16 = int_to_ptr.vmem [resolvable:$false] %s848_s16 }
  0x1e   : > { %765 = vmatprep.mubr.msk.bf16.mxu0 %vm329_vm1, %v841_v9  ;;  %s850_s17 = scalar_lea.vmem %s849_s16, 1024  ;;  %p851_p1 = scmp.lt.s32.totalorder %s1059_s10, %s849_s16 }
  0x1f   : > { %p852_p2 = scmp.lt.s32.totalorder %s850_s17, %s844_s14 }
  0x21   : > { %p853_p3 = por %p852_p2, %p851_p1 }
  0x23   : > { %p854_p5 = pnand %p853_p3, %p847_p0 }
  0x24   : > { %756 = vmatmul.mubr.msk.bf16.gmra.mrb[4].mxu1 %vm329_vm1, %v842_v10 }
  0x25   : > { %766 = vmatmul.mubr.msk.bf16.gmra.mrb[4].mxu0 %vm329_vm1, %v843_v11 }
  0xef   : > { %v753_v12 = vpop.f32.mrb[0].mxu1 }
  0xf0   : > { %v763_v13 = vpop.f32.mrb[0].mxu0  ;;  %v380_v15 = vpop.f32.mrb[1].mxu1 }
  0xf1   : > { %v489_v16 = vadd.f32 %v763_v13, %v753_v12  ;;  %v480_v17 = vpop.f32.mrb[1].mxu0  ;;  %v754_v18 = vpop.f32.mrb[2].mxu1 }
  0xf2   : > { %v481_v19 = vadd.f32 %v480_v17, %v380_v15  ;;  %v764_v20 = vpop.f32.mrb[2].mxu0  ;;  %v383_v21 = vpop.f32.mrb[3].mxu1 }
  0xf3   : > { %v520_v22 = vadd.f32 %v714_v14, %v489_v16  ;;  %v492_v23 = vadd.f32 %v764_v20, %v754_v18  ;;  %v483_v24 = vpop.f32.mrb[3].mxu0 }
  0xf4   : > { %v518_v25 = vadd.f32 %v714_v14, %v481_v19  ;;  %v484_v26 = vadd.f32 %v483_v24, %v383_v21 }
  0xf5   : > { %v528_v27 = vmax.f32 %v520_v22, 0.0  ;;  %v521_v28 = vadd.f32 %v714_v14, %v492_v23 }
  0xf6   : > { %v526_v29 = vmax.f32 %v518_v25, 0.0  ;;  %v519_v30 = vadd.f32 %v714_v14, %v484_v26 }
  0xf7   : > { %v732_v31 = vpack.c.bf16 %v528_v27, %v528_v27  ;;  %v529_v32 = vmax.f32 %v521_v28, 0.0  ;;  %v757_v33 = vpop.f32.mrb[4].mxu1 }
  0xf8   : > { %v730_v34 = vpack.c.bf16 %v526_v29, %v526_v29  ;;  %v527_v35 = vmax.f32 %v519_v30, 0.0  ;;  %v767_v36 = vpop.f32.mrb[4].mxu0  ;;  %v396_v37 = vpop.f32.mrb[5].mxu1 }
  0xf9   : > { %569 = vst.msk [vmem:[%s1040_s8 + $0x8] sm:$0xf] %vm566_vm2, %v732_v31  ;;  %v733_v38 = vpack.c.bf16 %v529_v32, %v529_v32  ;;  %v505_v39 = vadd.f32 %v767_v36, %v757_v33  ;;  %v496_v40 = vpop.f32.mrb[5].mxu0  ;;  %v758_v41 = vpop.f32.mrb[6].mxu1 }
  0xfa   : > { %567 = vst.msk [vmem:[%s1040_s8] sm:$0xf] %vm566_vm2, %v730_v34  ;;  %v731_v42 = vpack.c.bf16 %v527_v35, %v527_v35  ;;  %v497_v43 = vadd.f32 %v496_v40, %v396_v37  ;;  %v768_v44 = vpop.f32.mrb[6].mxu0  ;;  %v399_v45 = vpop.f32.mrb[7].mxu1 }
  0xfb   : > { %570 = vst.msk [vmem:[%s1040_s8 + $0xc] sm:$0xf] %vm566_vm2, %v733_v38  ;;  %v524_v46 = vadd.f32 %v714_v14, %v505_v39  ;;  %v508_v47 = vadd.f32 %v768_v44, %v758_v41  ;;  %v499_v48 = vpop.f32.mrb[7].mxu0 }
  0xfc   : > { %568 = vst.msk [vmem:[%s1040_s8 + $0x4] sm:$0xf] %vm566_vm2, %v731_v42  ;;  %v522_v49 = vadd.f32 %v714_v14, %v497_v43  ;;  %v500_v50 = vadd.f32 %v499_v48, %v399_v45 }
  0xfd   : > { %v532_v51 = vmax.f32 %v524_v46, 0.0  ;;  %v525_v52 = vadd.f32 %v714_v14, %v508_v47 }
  0xfe   : > { %v530_v53 = vmax.f32 %v522_v49, 0.0  ;;  %v523_v54 = vadd.f32 %v714_v14, %v500_v50 }
  0xff   : > { %v736_v55 = vpack.c.bf16 %v532_v51, %v532_v51  ;;  %v533_v56 = vmax.f32 %v525_v52, 0.0 }
 0x100   : > { %v734_v57 = vpack.c.bf16 %v530_v53, %v530_v53  ;;  %v531_v58 = vmax.f32 %v523_v54, 0.0 }
 0x101   : > { %573 = vst.msk [vmem:[%s1040_s8 + $0x18] sm:$0xf] %vm566_vm2, %v736_v55  ;;  %v737_v59 = vpack.c.bf16 %v533_v56, %v533_v56 }
 0x102   : > { %571 = vst.msk [vmem:[%s1040_s8 + $0x10] sm:$0xf] %vm566_vm2, %v734_v57  ;;  %v735_v60 = vpack.c.bf16 %v531_v58, %v531_v58 }
 0x103   : > { %574 = vst.msk [vmem:[%s1040_s8 + $0x1c] sm:$0xf] %vm566_vm2, %v737_v59 }
 0x104   : > { %572 = vst.msk [vmem:[%s1040_s8 + $0x14] sm:$0xf] %vm566_vm2, %v735_v60 }
 0x105   : > { %857 = shalt.err (!%p854_p5)
}
 0x106   : > { %s858_s24 = scalar_lea.hbm %s1057_s13, 512  ;;  %s862_s29 = scalar_lea.hbm %s1120_s5, 1024 }
 0x107   : > { %p859_p6 = scmp.ne.s32.totalorder %s1057_s13, %s858_s24  ;;  %p863_p10 = scmp.lt.u32.totalorder %s1057_s13, %s1120_s5 }
 0x108   : > { %p864_p11 = scmp.lt.u32.totalorder %s862_s29, %s858_s24  ;;  %p866_p13 = scmp.lt.u32.totalorder %s858_s24, %s1057_s13 }
 0x109   : > { %p860_p7 = pnand %p859_p6, %p997_p4 }
 0x10a   : > { %p865_p12 = por %p864_p11, %p863_p10 }
 0x10b   : > { %p861_p9 = pneg %p860_p7 }
 0x10c   : > { %p867_p0 = por %p866_p13, %p865_p12 }
 0x10e   : > { %p868_p1 = pnand %p867_p0, %p861_p9 }
 0x110   : > { %871 = shalt.err (!%p868_p1)
}
 0x111   : > { %s925_s9 = smov 64   ;;  %s926_s11 = smov 4  }
 0x112   : > { %779 = dma.vmem_to_hbm [thread:$0]  (%p997_p4), %s1059_s10, 512, %s1057_s13, %s1069_s21, %s925_s9, %s925_s9, %s926_s11  }
 0x113 PF: > { %p785_p2 = scmp.ge.s32.totalorder %s922_s23, 2  ;;  %s606_s12 = sand.u32 1, %s902_s18  }
 0x114   : > { %s607_s14 = scalar_lea.sflag [#allocation3], %s606_s12 }
 0x115   : > { %p782_p3 = pnand %p785_p2, %p1004_p8 }
 0x117   : > { %897 = dma.done.wait (!%p782_p3), %s607_s14, 512  }
 0x118   : > { %899 = vsyncadd (!%p782_p3), %s607_s14, 4294966784  ;;  %s18_s23 = sadd.s32 1, %s922_s23   ;;  %s1123_s18 = smov %s906_s19 }
 0x119   : > { %p15_p5 = scmp.ge.s32.totalorder %s18_s23, 4   ;;  %s1124_s19 = smov %s910_s20 }
 0x11a   : > { %s1125_s20 = smov %s1010_s6  ;;  %s1126_s21 = smov %s918_s22 }
 0x11b   : > { %s1127_s22 = smov %s1129_s26  ;;  %17 = sbr.rel (!%p15_p5) target bundleno = 4 (0x4), region = 78 }
 0x122   :  { %612 = vsyncpa [#allocation3], 1 }
 0x123   :  { %614 = vsyncpa [#allocation3 + $0x1], 1 }

// kernel: csp_stage_forward.4
= control target key start
LH: loop header
LB: loop body
LE: loop exit
PB: predicated region body
PF: predicated region fallthrough
CT: control target
= control target key end

     0   :  { %s1481_s21 = smov 0   ;;  %s1483_s22 = smov 0   ;;  %s1697_s0 = inlined_call_operand.vmem [shape: bf16[2,9,9,16], index: 0, kind: input, shape index: {}]   ;;  %s1698_s1 = inlined_call_operand.vmem [shape: bf16[4,16,8], index: 1, kind: input, shape index: {}]   ;;  %s1699_s2 = inlined_call_operand.vmem [shape: f32[1,8], index: 2, kind: input, shape index: {}]   ;;  %s1700_s3 = inlined_call_operand.vmem [shape: bf16[8,8], index: 3, kind: input, shape index: {}]   ;;  %s1701_s4 = inlined_call_operand.vmem [shape: f32[1,8], index: 4, kind: input, shape index: {}]   ;;  %s1702_s5 = inlined_call_operand.vmem [shape: bf16[2,8,8,4], index: 5, kind: output, shape index: {0}]   ;;  %s1703_s6 = inlined_call_operand.vmem [shape: bf16[2,8,8,4], index: 6, kind: output, shape index: {1}]  }
   0x1   :  { %s1485_s23 = smov 0  }
   0x2 LB: > { %s29_s24 = sadd.s32 1, %s1439_s22  ;;  %p1199_p0 = scmp.ge.s32.totalorder %s1443_s23, 1  ;;  %s1443_s23 = sphi %s1485_s23, %s17_s23   ;;  %s1439_s22 = sphi %s1483_s22, %s1707_s22   ;;  %s1435_s21 = sphi %s1481_s21, %s1706_s21  }
   0x3   : > { %p31_p1 = scmp.ge.s32.totalorder %s29_s24, 2  ;;  %p235_p2 = scmp.lt.s32.totalorder %s1443_s23, 3 }
   0x5   : > { %s1709_s24 = smov (%p31_p1, %s29_s24), 0  ;;  %p236_p3 = pnand %p1199_p0, %p235_p2 }
   0x6   : > { %v1409_v0 = vld [vmem:[%s1698_s1] sm:$0xff] (!%p236_p3)   ;;  %p280_p4 = scmp.lt.s32.totalorder (!%p236_p3), %s1435_s21, 1  ;;  %v1410_v1 = vld [vmem:[%s1698_s1 + $0x8] sm:$0xff] (!%p236_p3)   ;;  %v1510_v2 = vld [vmem:[%s1698_s1 + $0x10] sm:$0xff] (!%p236_p3)   ;;  %vm361_vm0 = vcmask (!%p236_p3), 130048   ;;  %vm914_vm4 = vcmask (!%p236_p3), 1043456  }
   0x7   : > { %239 = sbr.rel (%p236_p3) target bundleno = 634 (0x27a), region = 40  ;;  %1298 = vmatprep.subr.bf16.mxu1 (!%p236_p3), %v1409_v0  ;;  %1308 = vmatprep.subr.bf16.mxu0 (!%p236_p3), %v1410_v1  ;;  %vm447_vm1 = vsmask.f32 (!%p236_p3), 3328  ;;  %vm448_vm2 = vsmask.f32 (!%p236_p3), 7440  ;;  %vm901_vm5 = vcmask (!%p236_p3), 64512  }
   0x8   : > { %1299 = vmatpush3.bf16.msra.mxu1 (!%p236_p3), %v1409_v0  ;;  %1309 = vmatpush3.bf16.msra.mxu0 (!%p236_p3), %v1410_v1  ;;  %vm1545_vm3 = vmor (!%p236_p3), %vm447_vm1, %vm448_vm2  ;;  %vm1023_vm6 = vcmask (!%p236_p3), 27648   ;;  %s1445_s27 = smov (!%p236_p3), 124  }
   0x9   : > { %1348 = vmatprep.subr.bf16.mxu1 (!%p236_p3), %v1410_v1  ;;  %1318 = vmatprep.subr.bf16.mxu0 (!%p236_p3), %v1510_v2 }
   0xe   : > { %s1711_s21 = smov (!%p280_p4, %s1435_s21), 1 }
   0xf   : > { %s1383_s7 = smul.u32 72, %s1711_s21  ;;  %s1263_s19 = sshll.u32 %s1711_s21, 5 }
  0x10   : > { %s1649_s26 = scalar_lea.vmem %s1702_s5, %s1263_s19  ;;  %s304_s30 = scalar_lea.vmem %s1703_s6, %s1263_s19 }
  0x11   : > { %s1517_s10 = scalar_lea.vmem %s1697_s0, %s1383_s7 }
  0x12   : > { %v307_v3 = vld [vmem:[%s1517_s10] sm:$0xf]  ;;  %v1521_v4 = vld [vmem:[%s1517_s10 + $0x8] sm:$0xf]  ;;  %v1524_v5 = vld [vmem:[%s1517_s10 + $0x10] sm:$0xf] }
  0x13   : > { %v1206_v6 = vcombine.low %v307_v3, %v1521_v4  ;;  %v451_v7 = vshrl.u32 %v307_v3, 16  ;;  %v454_v8 = vshll.u32 %v307_v3, 16  ;;  %v465_v9 = vshrl.u32 %v1521_v4, 16  ;;  %v1529_v10 = vld [vmem:[%s1517_s10 + $0x18] sm:$0xf] }
  0x14   : > { %v468_v11 = vshll.u32 %v1521_v4, 16  ;;  %v1207_v12 = vcombine.low %v1524_v5, %v1529_v10  ;;  %v308_v13 = vld [vmem:[%s1517_s10 + $0x4] sm:$0x1]  ;;  %v310_v14 = vld [vmem:[%s1517_s10 + $0xc] sm:$0x1]  ;;  %v479_v15 = vshrl.u32 %v1524_v5, 16 }
  0x15   : > { %1300 = vmatprep.mubr.msk.bf16.mxu1 %vm361_vm0, %v1206_v6  ;;  %v453_v16 = vrot.slane %v451_v7, 4  ;;  %v456_v17 = vrot.slane %v454_v8, 5  ;;  %v312_v18 = vld [vmem:[%s1517_s10 + $0x14] sm:$0x1]  ;;  %v460_v19 = vshll.u32 %v308_v13, 16  ;;  %v467_v20 = vrot.slane %v465_v9, 4 }
  0x16   : > { %1301 = vmatmul.mubr.msk.bf16.vlgmr.msra.gmra.mrb[0].mxu1 %vm361_vm0, %v1207_v12  ;;  %v314_v21 = vld [vmem:[%s1517_s10 + $0x1c] sm:$0x1]  ;;  %v470_v23 = vrot.slane %v468_v11, 5  ;;  %v474_v24 = vshll.u32 %v310_v14, 16  ;;  %v481_v25 = vrot.slane %v479_v15, 4  ;;  %v482_v29 = vshll.u32 %v1524_v5, 16 }
  0x17   : > { %v457_v22 = vor.u32 %v456_v17, %v453_v16  ;;  %1349 = vmatpush3.bf16.msra.mxu1 %v1410_v1  ;;  %v1542_v26 = vld [vmem:[%s1517_s10 + $0x20] sm:$0xf]  ;;  %v462_v28 = vrot.slane %v460_v19, 5  ;;  %v488_v30 = vshll.u32 %v312_v18, 16  ;;  %v493_v31 = vshrl.u32 %v1529_v10, 16  ;;  %v1417_v11 = vld [vmem:[%s1698_s1 + $0x18] sm:$0xff]  }
  0x18   : > { %v316_v32 = vld [vmem:[%s1517_s10 + $0x24] sm:$0x1]  ;;  %v471_v34 = vor.u32 %v470_v23, %v467_v20  ;;  %v476_v35 = vrot.slane %v474_v24, 5  ;;  %v496_v36 = vshll.u32 %v1529_v10, 16  ;;  %v484_v37 = vrot.slane %v482_v29, 5 }
  0x19   : > { %v458_v33 = vrot.slane %v457_v22, 4  ;;  %v495_v38 = vrot.slane %v493_v31, 4  ;;  %v502_v39 = vshll.u32 %v314_v21, 16  ;;  %v1554_v40 = vld [vmem:[%s1517_s10 + $0x28] sm:$0xf]  ;;  %v507_v44 = vshrl.u32 %v1542_v26, 16 }
  0x1a   : > { %v472_v42 = vrot.slane %v471_v34, 4  ;;  %v498_v43 = vrot.slane %v496_v36, 5  ;;  %v1560_v45 = vld [vmem:[%s1517_s10 + $0x30] sm:$0xf]  ;;  %v485_v46 = vor.u32 %v484_v37, %v481_v25  ;;  %v490_v47 = vrot.slane %v488_v30, 5 }
  0x1b   : > { %v463_v41 = vsel %vm1545_vm3, %v458_v33, %v462_v28  ;;  %v504_v48 = vrot.slane %v502_v39, 5  ;;  %v510_v49 = vshll.u32 %v1542_v26, 16  ;;  %v1564_v50 = vld [vmem:[%s1517_s10 + $0x38] sm:$0xf]  ;;  %v509_v53 = vrot.slane %v507_v44, 4 }
  0x1c   : > { %v1568_v51 = vsel %vm1545_vm3, %v472_v42, %v476_v35  ;;  %v499_v52 = vor.u32 %v498_v43, %v495_v38  ;;  %v1208_v54 = vcombine.low %v1542_v26, %v1554_v40  ;;  %v486_v55 = vrot.slane %v485_v46, 4  ;;  %v318_v12 = vld [vmem:[%s1517_s10 + $0x2c] sm:$0x1]  ;;  %v320_v16 = vld [vmem:[%s1517_s10 + $0x34] sm:$0x1] }
  0x1d   : > { %v512_v56 = vrot.slane %v510_v49, 5  ;;  %v516_v57 = vshll.u32 %v316_v32, 16  ;;  %v1217_v58 = vcombine.low %v463_v41, %v1568_v51  ;;  %v521_v60 = vshrl.u32 %v1554_v40, 16  ;;  %v322_v17 = vld [vmem:[%s1517_s10 + $0x3c] sm:$0x1] }
  0x1e   : > { %v500_v59 = vrot.slane %v499_v52, 4  ;;  %1304 = vmatprep.mubr.msk.bf16.mxu1 %vm361_vm0, %v1208_v54  ;;  %v524_v61 = vshll.u32 %v1554_v40, 16  ;;  %v1209_v62 = vcombine.low %v1560_v45, %v1564_v50  ;;  %v491_v63 = vsel %vm1545_vm3, %v486_v55, %v490_v47  ;;  %v323_v44 = vld [vmem:[%s1517_s10 + $0x40] sm:$0xf]  ;;  %v324_v52 = vld [vmem:[%s1517_s10 + $0x44] sm:$0x1] }
  0x1f   : > { %v513_v0 = vor.u32 %v512_v56, %v509_v53  ;;  %1310 = vmatprep.mubr.msk.bf16.mxu0 %vm361_vm0, %v1217_v58  ;;  %v535_v1 = vshrl.u32 %v1560_v45, 16  ;;  %v538_v3 = vshll.u32 %v1560_v45, 16  ;;  %v549_v7 = vshrl.u32 %v1564_v50, 16 }
  0x20   : > { %v1585_v6 = vsel %vm1545_vm3, %v500_v59, %v504_v48  ;;  %1305 = vmatmul.mubr.msk.bf16.gmra.mrb[4].mxu1 %vm361_vm0, %v1209_v62  ;;  %v552_v8 = vshll.u32 %v1564_v50, 16  ;;  %v1228_v9 = vcombine.low %v1521_v4, %v1524_v5  ;;  %v518_v18 = vrot.slane %v516_v57, 5  ;;  %v893_v57 = vld [vmem:[%s1700_s3] sm:$0xf] }
  0x21   : > { %v1218_v13 = vcombine.low %v491_v63, %v1585_v6  ;;  %v537_v14 = vrot.slane %v535_v1, 4  ;;  %v540_v15 = vrot.slane %v538_v3, 5  ;;  %v551_v19 = vrot.slane %v549_v7, 4  ;;  %1382 = vmatprep.subr.msk.bf16.mxu1 %vm914_vm4, %v893_v57  ;;  %v1205_v3 = vld [vmem:[%s1699_s2] ss:$0 sm:$0xff] }
  0x22   : > { %v554_v20 = vrot.slane %v552_v8, 5  ;;  %v523_v21 = vrot.slane %v521_v60, 4  ;;  %v514_v22 = vrot.slane %v513_v0, 4  ;;  %v526_v4 = vrot.slane %v524_v61, 5 }
  0x23   : > { %1311 = vmatmul.mubr.msk.bf16.vlgmr.msra.gmra.mrb[0].mxu0 %vm361_vm0, %v1218_v13  ;;  %v541_v23 = vor.u32 %v540_v15, %v537_v14  ;;  %v530_v5 = vshll.u32 %v318_v12, 16  ;;  %v544_v25 = vshll.u32 %v320_v16, 16  ;;  %v558_v28 = vshll.u32 %v322_v17, 16 }
  0x24   : > { %1319 = vmatpush3.bf16.msra.mxu0 %v1510_v2  ;;  %v555_v24 = vor.u32 %v554_v20, %v551_v19  ;;  %1320 = vmatprep.mubr.msk.bf16.mxu0 %vm361_vm0, %v1228_v9  ;;  %v527_v30 = vor.u32 %v526_v4, %v523_v21  ;;  %v519_v35 = vsel %vm1545_vm3, %v514_v22, %v518_v18  ;;  %v769_v46 = vshrl.u32 %v323_v44, 16 }
  0x25   : > { %v542_v29 = vrot.slane %v541_v23, 4  ;;  %1328 = vmatprep.subr.bf16.mxu0 %v1417_v11  ;;  %v532_v31 = vrot.slane %v530_v5, 5  ;;  %v546_v33 = vrot.slane %v544_v25, 5  ;;  %v560_v34 = vrot.slane %v558_v28, 5 }
  0x26   : > { %v556_v32 = vrot.slane %v555_v24, 4  ;;  %v528_v36 = vrot.slane %v527_v30, 4  ;;  %v1229_v42 = vcombine.low %v1529_v10, %v1542_v26  ;;  %v1230_v43 = vcombine.low %v1554_v40, %v1560_v45 }
  0x27   : > { %v547_v2 = vsel %vm1545_vm3, %v542_v29, %v546_v33  ;;  %v772_v47 = vshll.u32 %v323_v44, 16  ;;  %v1231_v48 = vcombine.low %v1564_v50, %v323_v44  ;;  %v1239_v49 = vcombine.low %v1568_v51, %v491_v63 }
  0x28   : > { %v561_v37 = vsel %vm1545_vm3, %v556_v32, %v560_v34  ;;  %v533_v38 = vsel %vm1545_vm3, %v528_v36, %v532_v31  ;;  %v771_v10 = vrot.slane %v769_v46, 4  ;;  %v778_v45 = vshll.u32 %v324_v52, 16 }
  0x29   : > { %v1220_v39 = vcombine.low %v547_v2, %v561_v37  ;;  %v1219_v41 = vcombine.low %v519_v35, %v533_v38  ;;  %v774_v26 = vrot.slane %v772_v47, 5  ;;  %v1240_v53 = vcombine.low %v1585_v6, %v519_v35 }
  0x2a   : > { %v1241_v54 = vcombine.low %v533_v38, %v547_v2  ;;  %v780_v56 = vrot.slane %v778_v45, 5  ;;  %v916_v58 = vsel %vm914_vm4, %v893_v57, 0 }
  0x2b   : > { %1314 = vmatprep.mubr.msk.bf16.mxu1 %vm361_vm0, %v1219_v41  ;;  %v775_v40 = vor.u32 %v774_v26, %v771_v10 }
  0x2c   : > { %1315 = vmatmul.mubr.msk.bf16.vlgmr.msra.gmra.mrb[4].mxu1 %vm361_vm0, %v1220_v39 }
  0x2d   : > { %v776_v55 = vrot.slane %v775_v40, 4  ;;  %1339 = vmatpush3.bf16.msra.mxu1 %v916_v58 }
  0x2f   : > { %1321 = vmatmul.mubr.msk.bf16.vlgmr.msra.gmra.mrb[0].mxu0 %vm361_vm0, %v1229_v42  ;;  %v781_v50 = vsel %vm1545_vm3, %v776_v55, %v780_v56 }
  0x30   : > { %1329 = vmatpush3.bf16.msra.mxu0 %v1417_v11  ;;  %1324 = vmatprep.mubr.msk.bf16.mxu0 %vm361_vm0, %v1230_v43  ;;  %v1242_v51 = vcombine.low %v561_v37, %v781_v50  ;;  %v1248_v43 = vld [vmem:[%s1701_s4] ss:$0 sm:$0xff] }
  0x37   : > { %1325 = vmatmul.mubr.msk.bf16.gmra.mrb[4].mxu0 %vm361_vm0, %v1231_v48 }
  0x38   : > { %1330 = vmatprep.mubr.msk.bf16.mxu0 %vm361_vm0, %v1239_v49 }
  0x3f   : > { %1331 = vmatmul.mubr.msk.bf16.vlgmr.msra.gmra.mrb[0].mxu0 %vm361_vm0, %v1240_v53 }
  0x40   : > { %1334 = vmatprep.mubr.msk.bf16.mxu0 %vm361_vm0, %v1241_v54 }
  0x47   : > { %1335 = vmatmul.mubr.msk.bf16.gmra.mrb[4].mxu0 %vm361_vm0, %v1242_v51 }
  0xe9   : > { %v1302_v59 = vpop.f32.mrb[0].mxu1 }
  0xea   : > { %v408_v60 = vpop.f32.mrb[1].mxu1  ;;  %v441_v6 = vadd.f32 %v1302_v59, %v1205_v3 }
  0xeb   : > { %v1303_v61 = vpop.f32.mrb[2].mxu1  ;;  %v439_v7 = vadd.f32 %v1205_v3, %v408_v60 }
  0xec   : > { %v411_v62 = vpop.f32.mrb[3].mxu1  ;;  %v442_v9 = vadd.f32 %v1303_v61, %v1205_v3 }
  0xed   : > { %v440_v13 = vadd.f32 %v1205_v3, %v411_v62 }
  0xff   : > { %v1316_v63 = vpop.f32.mrb[4].mxu1 }
 0x100   : > { %v645_v0 = vpop.f32.mrb[5].mxu1  ;;  %v1358_v23 = vadd.f32 %v1316_v63, %v1205_v3 }
 0x101   : > { %v1317_v1 = vpop.f32.mrb[6].mxu1  ;;  %v1360_v5 = vadd.f32 %v1205_v3, %v645_v0 }
 0x102   : > { %v648_v27 = vpop.f32.mrb[7].mxu1  ;;  %v1362_v28 = vadd.f32 %v1317_v1, %v1205_v3 }
 0x103   : > { %v1364_v31 = vadd.f32 %v1205_v3, %v648_v27 }
 0x112   : > { %v1332_v8 = vpop.f32.mrb[0].mxu0 }
 0x113   : > { %v1351_v11 = vadd.f32 %v1332_v8, %v441_v6  ;;  %v842_v12 = vpop.f32.mrb[1].mxu0 }
 0x114   : > { %v1353_v14 = vadd.f32 %v842_v12, %v439_v7  ;;  %v1333_v15 = vpop.f32.mrb[2].mxu0 }
 0x115   : > { %v1355_v16 = vadd.f32 %v1333_v15, %v442_v9  ;;  %v845_v17 = vpop.f32.mrb[3].mxu0  ;;  %v883_v19 = vmax.f32 %v1351_v11, 0.0 }
 0x116   : > { %v1357_v18 = vadd.f32 %v845_v17, %v440_v13  ;;  %v881_v21 = vmax.f32 %v1353_v14, 0.0 }
 0x117   : > { %v884_v20 = vmax.f32 %v1355_v16, 0.0 }
 0x118   : > { %v882_v22 = vmax.f32 %v1357_v18, 0.0 }
 0x119   : > { %v890_v4 = vpack.c.bf16 %v884_v20, %v883_v19 }
 0x11a   : > { %v889_v24 = vpack.c.bf16 %v882_v22, %v881_v21  ;;  %v1336_v25 = vpop.f32.mrb[4].mxu0 }
 0x11b   : > { %v1359_v29 = vadd.f32 %v1358_v23, %v1336_v25  ;;  %v858_v30 = vpop.f32.mrb[5].mxu0 }
 0x11c   : > { %v1361_v32 = vadd.f32 %v1360_v5, %v858_v30  ;;  %v1337_v33 = vpop.f32.mrb[6].mxu0  ;;  %1340 = vmatprep.mubr.msk.bf16.mxu1 %vm901_vm5, %v889_v24 }
 0x11d   : > { %v1363_v34 = vadd.f32 %v1362_v28, %v1337_v33  ;;  %v861_v35 = vpop.f32.mrb[7].mxu0  ;;  %1341 = vmatmul.mubr.msk.bf16.vlgmr.msra.gmra.mrb[8].mxu1 %vm901_vm5, %v890_v4  ;;  %v887_v2 = vmax.f32 %v1359_v29, 0.0 }
 0x11e   : > { %v1365_v36 = vadd.f32 %v1364_v31, %v861_v35  ;;  %v885_v38 = vmax.f32 %v1361_v32, 0.0 }
 0x11f   : > { %v888_v37 = vmax.f32 %v1363_v34, 0.0 }
 0x120   : > { %v886_v39 = vmax.f32 %v1365_v36, 0.0 }
 0x121   : > { %v892_v41 = vpack.c.bf16 %v888_v37, %v887_v2 }
 0x122   : > { %v891_v42 = vpack.c.bf16 %v886_v39, %v885_v38 }
 0x124   : > { %1344 = vmatprep.mubr.msk.bf16.mxu1 %vm901_vm5, %v891_v42 }
 0x125   : > { %1345 = vmatmul.mubr.msk.bf16.gmra.mrb[12].mxu1 %vm901_vm5, %v892_v41 }
 0x1f0   : > { %v1342_v44 = vpop.f32.mrb[8].mxu1 }
 0x1f1   : > { %v961_v46 = vadd.f32 %v1342_v44, %v1248_v43  ;;  %v952_v47 = vpop.f32.mrb[9].mxu1 }
 0x1f2   : > { %v953_v48 = vadd.f32 %v1248_v43, %v952_v47  ;;  %v1343_v49 = vpop.f32.mrb[10].mxu1 }
 0x1f3   : > { %v985_v10 = vmax.f32 %v961_v46, 0.0  ;;  %v964_v26 = vadd.f32 %v1343_v49, %v1248_v43  ;;  %v955_v52 = vpop.f32.mrb[11].mxu1 }
 0x1f4   : > { %v983_v40 = vmax.f32 %v953_v48, 0.0  ;;  %v956_v45 = vadd.f32 %v1248_v43, %v955_v52 }
 0x1f5   : > { %v986_v53 = vmax.f32 %v964_v26, 0.0  ;;  %v1267_v54 = vpack.c.bf16 %v985_v10, %v985_v10 }
 0x1f6   : > { %v984_v55 = vmax.f32 %v956_v45, 0.0  ;;  %v1265_v56 = vpack.c.bf16 %v983_v40, %v983_v40 }
 0x1f7   : > { %v1268_v50 = vpack.c.bf16 %v986_v53, %v986_v53  ;;  %1036 = vrot.lane.b32.xlu1 %v1267_v54, %s1445_s27  ;;  %1026 = vst.msk [vmem:[%s1649_s26 + $0x8] sm:$0xf] %vm1023_vm6, %v1267_v54 }
 0x1f8   : > { %v1266_v51 = vpack.c.bf16 %v984_v55, %v984_v55  ;;  %v1346_v57 = vpop.f32.mrb[12].mxu1  ;;  %1032 = vrot.lane.b32.xlu0 %v1265_v56, %s1445_s27  ;;  %1024 = vst.msk [vmem:[%s1649_s26] sm:$0xf] %vm1023_vm6, %v1265_v56 }
 0x1f9   : > { %1027 = vst.msk [vmem:[%s1649_s26 + $0xc] sm:$0xf] %vm1023_vm6, %v1268_v50  ;;  %v977_v58 = vadd.f32 %v1346_v57, %v1248_v43  ;;  %v968_v59 = vpop.f32.mrb[13].mxu1 }
 0x1fa   : > { %1025 = vst.msk [vmem:[%s1649_s26 + $0x4] sm:$0xf] %vm1023_vm6, %v1266_v51  ;;  %v969_v60 = vadd.f32 %v1248_v43, %v968_v59  ;;  %v1347_v61 = vpop.f32.mrb[14].mxu1 }
 0x1fb   : > { %v989_v62 = vmax.f32 %v977_v58, 0.0  ;;  %v980_v63 = vadd.f32 %v1347_v61, %v1248_v43  ;;  %1038 = vrot.lane.b32.xlu1 %v1268_v50, %s1445_s27  ;;  %v971_v0 = vpop.f32.mrb[15].mxu1 }
 0x1fc   : > { %v987_v1 = vmax.f32 %v969_v60, 0.0  ;;  %v972_v27 = vadd.f32 %v1248_v43, %v971_v0  ;;  %1034 = vrot.lane.b32.xlu0 %v1266_v51, %s1445_s27 }
 0x1fd   : > { %v1271_v3 = vpack.c.bf16 %v989_v62, %v989_v62  ;;  %v990_v6 = vmax.f32 %v980_v63, 0.0 }
 0x1fe   : > { %v1269_v7 = vpack.c.bf16 %v987_v1, %v987_v1  ;;  %v988_v8 = vmax.f32 %v972_v27, 0.0 }
 0x1ff   : > { %1030 = vst.msk [vmem:[%s1649_s26 + $0x18] sm:$0xf] %vm1023_vm6, %v1271_v3  ;;  %v1272_v9 = vpack.c.bf16 %v990_v6, %v990_v6 }
 0x200   : > { %1028 = vst.msk [vmem:[%s1649_s26 + $0x10] sm:$0xf] %vm1023_vm6, %v1269_v7  ;;  %v1270_v11 = vpack.c.bf16 %v988_v8, %v988_v8  ;;  %1040 = vrot.lane.b32.xlu0 %v1269_v7, %s1445_s27 }
 0x201   : > { %1031 = vst.msk [vmem:[%s1649_s26 + $0x1c] sm:$0xf] %vm1023_vm6, %v1272_v9 }
 0x202   : > { %1029 = vst.msk [vmem:[%s1649_s26 + $0x14] sm:$0xf] %vm1023_vm6, %v1270_v11  ;;  %1042 = vrot.lane.b32.xlu1 %v1270_v11, %s1445_s27 }
 0x204   : > { %1044 = vrot.lane.b32.xlu0 %v1271_v3, %s1445_s27 }
 0x206   : > { %1046 = vrot.lane.b32.xlu1 %v1272_v9, %s1445_s27 }
 0x269   : > { %v1037_v12 = vpop.permute.xlu1 %1036 }
 0x26a   : > { %1058 = vst.msk [vmem:[%s304_s30 + $0x8] sm:$0xf] %vm1023_vm6, %v1037_v12  ;;  %v1033_v13 = vpop.permute.xlu0 %1032 }
 0x26b   : > { %1056 = vst.msk [vmem:[%s304_s30] sm:$0xf] %vm1023_vm6, %v1033_v13 }
 0x26d   : > { %v1039_v14 = vpop.permute.xlu1 %1038 }
 0x26e   : > { %1059 = vst.msk [vmem:[%s304_s30 + $0xc] sm:$0xf] %vm1023_vm6, %v1039_v14  ;;  %v1035_v15 = vpop.permute.xlu0 %1034 }
 0x26f   : > { %1057 = vst.msk [vmem:[%s304_s30 + $0x4] sm:$0xf] %vm1023_vm6, %v1035_v15 }
 0x272   : > { %v1041_v16 = vpop.permute.xlu0 %1040 }
 0x273   : > { %1060 = vst.msk [vmem:[%s304_s30 + $0x10] sm:$0xf] %vm1023_vm6, %v1041_v16 }
 0x274   : > { %v1043_v17 = vpop.permute.xlu1 %1042 }
 0x275   : > { %1061 = vst.msk [vmem:[%s304_s30 + $0x14] sm:$0xf] %vm1023_vm6, %v1043_v17 }
 0x276   : > { %v1045_v18 = vpop.permute.xlu0 %1044 }
 0x277   : > { %1062 = vst.msk [vmem:[%s304_s30 + $0x18] sm:$0xf] %vm1023_vm6, %v1045_v18 }
 0x278   : > { %v1047_v19 = vpop.permute.xlu1 %1046 }
 0x279   : > { %1063 = vst.msk [vmem:[%s304_s30 + $0x1c] sm:$0xf] %vm1023_vm6, %v1047_v19 }
 0x27a PF: > { %s17_s23 = sadd.s32 1, %s1443_s23   ;;  %s1706_s21 = smov %s1439_s22 }
 0x27b   : > { %p14_p5 = scmp.ge.s32.totalorder %s17_s23, 4   ;;  %s1707_s22 = smov %s1709_s24 }
 0x27d   :  { %16 = sbr.rel (!%p14_p5) target bundleno = 2 (0x2), region = 85 }

// kernel: csp_stage_forward.5
= control target key start
LH: loop header
LB: loop body
LE: loop exit
PB: predicated region body
PF: predicated region fallthrough
CT: control target
= control target key end

     0   :  { %s1805_s18 = smov 0   ;;  %s2031_s0 = inlined_call_operand.vmem [shape: bf16[2,8,8,4], index: 0, kind: input, shape index: {}]   ;;  %s2032_s1 = inlined_call_operand.vmem [shape: bf16[4,4], index: 1, kind: input, shape index: {}]   ;;  %s2033_s2 = inlined_call_operand.vmem [shape: f32[1,4], index: 2, kind: input, shape index: {}]   ;;  %s2034_s3 = inlined_call_operand.vmem [shape: bf16[9,4,4], index: 3, kind: input, shape index: {}]   ;;  %s2035_s4 = inlined_call_operand.vmem [shape: f32[1,4], index: 4, kind: input, shape index: {}]   ;;  %s2036_s5 = inlined_call_operand.vmem [shape: bf16[2,8,8,4], index: 5, kind: output, shape index: {}]  }
   0x1 LB: > { %s1434_s19 = sadd.s32 4294967295, %s1772_s18   ;;  %p1438_p0 = scmp.ge.s32.totalorder %s1772_s18, 1  ;;  %s1772_s18 = sphi %s1805_s18, %s15_s18  }
   0x2   : > { %p187_p1 = scmp.lt.s32.totalorder %s1772_s18, 3 }
   0x4   : > { %p188_p2 = pnand %p1438_p0, %p187_p1 }
   0x5   : > { %v234_v0 = vld [vmem:[%s2032_s1] sm:$0x3] (!%p188_p2)  ;;  %vm275_vm0 = vcmask (!%p188_p2), 1041408   ;;  %p215_p3 = scmp.lt.s32.totalorder (!%p188_p2), %s1434_s19, 1  ;;  %vm262_vm1 = vcmask (!%p188_p2), 31744   ;;  %vm358_vm2 = vcmask (!%p188_p2), 24576  }
   0x6   : > { %191 = sbr.rel (%p188_p2) target bundleno = 545 (0x221), region = 40  ;;  %1739 = vmatprep.subr.msk.bf16.mxu0 (!%p188_p2), %vm275_vm0, %v234_v0  ;;  %v277_v1 = vsel (!%p188_p2), %vm275_vm0, %v234_v0, 0  ;;  %vm353_vm3 = vcmask (!%p188_p2), 25600   ;;  %v1774_v6 = vmov (!%p188_p2), 0.0   ;;  %v408_v7 = vld [vmem:[%s2034_s3] sm:$0x3] (!%p188_p2) }
   0x7   : > { %1568 = vmatpush3.bf16.msra.mxu0 (!%p188_p2), %v277_v1  ;;  %352 = vst.msk [vmem:[#allocation2] sm:$0xff] (!%p188_p2), %vm262_vm1, %v1774_v6  ;;  %356 = vst.msk [vmem:[#allocation2 + $0x90] sm:$0xff] (!%p188_p2), %vm262_vm1, %v1774_v6  ;;  %v1472_v8 = vld [vmem:[%s2034_s3 + $0x8] sm:$0x3] (!%p188_p2)  ;;  %v422_v9 = vsel (!%p188_p2), %vm275_vm0, %v408_v7, 0  ;;  %vm1370_vm4 = vcmask (!%p188_p2), 27648  }
   0x8   : > { %360 = vst.msk [vmem:[#allocation2 + $0x10] sm:$0x1] (!%p188_p2), %vm358_vm2, %v1774_v6  ;;  %361 = vst.msk [vmem:[#allocation2 + $0x20] sm:$0x1] (!%p188_p2), %vm358_vm2, %v1774_v6  ;;  %1740 = vmatprep.subr.msk.bf16.mxu0 (!%p188_p2), %vm275_vm0, %v408_v7  ;;  %1744 = vmatprep.subr.msk.bf16.mxu1 (!%p188_p2), %vm275_vm0, %v1472_v8  ;;  %v830_v10 = vsel (!%p188_p2), %vm275_vm0, %v1472_v8, 0 }
   0x9   : > { %362 = vst.msk [vmem:[#allocation2 + $0x30] sm:$0x1] (!%p188_p2), %vm358_vm2, %v1774_v6  ;;  %363 = vst.msk [vmem:[#allocation2 + $0x40] sm:$0x1] (!%p188_p2), %vm358_vm2, %v1774_v6  ;;  %1618 = vmatpush3.bf16.msra.mxu1 (!%p188_p2), %v830_v10  ;;  %v1477_v11 = vld [vmem:[%s2034_s3 + $0xa] sm:$0x3] (!%p188_p2) }
   0xa   : > { %364 = vst.msk [vmem:[#allocation2 + $0x50] sm:$0x1] (!%p188_p2), %vm358_vm2, %v1774_v6  ;;  %365 = vst.msk [vmem:[#allocation2 + $0x60] sm:$0x1] (!%p188_p2), %vm358_vm2, %v1774_v6  ;;  %1745 = vmatprep.subr.msk.bf16.mxu1 (!%p188_p2), %vm275_vm0, %v1477_v11  ;;  %v1457_v12 = vld [vmem:[%s2034_s3 + $0x2] sm:$0x3] (!%p188_p2) }
   0xb   : > { %366 = vst.msk [vmem:[#allocation2 + $0x70] sm:$0x1] (!%p188_p2), %vm358_vm2, %v1774_v6  ;;  %367 = vst.msk [vmem:[#allocation2 + $0x80] sm:$0x1] (!%p188_p2), %vm358_vm2, %v1774_v6  ;;  %v1443_v13 = vld [vmem:[%s2033_s2] ss:$0 sm:$0xff] (!%p188_p2) }
   0xc   : > { %370 = vst.msk [vmem:[#allocation2 + $0x19] sm:$0x1] (!%p188_p2), %vm358_vm2, %v1774_v6  ;;  %371 = vst.msk [vmem:[#allocation2 + $0x29] sm:$0x1] (!%p188_p2), %vm358_vm2, %v1774_v6  ;;  %v524_v49 = vsel (!%p188_p2), %vm275_vm0, %v1457_v12, 0  ;;  %v932_v51 = vsel (!%p188_p2), %vm275_vm0, %v1477_v11, 0 }
   0xd   : > { %s2038_s19 = smov (!%p215_p3, %s1434_s19), 1  ;;  %372 = vst.msk [vmem:[#allocation2 + $0x39] sm:$0x1] %vm358_vm2, %v1774_v6  ;;  %373 = vst.msk [vmem:[#allocation2 + $0x49] sm:$0x1] %vm358_vm2, %v1774_v6 }
   0xe   : > { %s1507_s22 = sshll.u32 %s2038_s19, 5  ;;  %374 = vst.msk [vmem:[#allocation2 + $0x59] sm:$0x1] %vm358_vm2, %v1774_v6  ;;  %375 = vst.msk [vmem:[#allocation2 + $0x69] sm:$0x1] %vm358_vm2, %v1774_v6 }
   0xf   : > { %s219_s25 = scalar_lea.vmem %s2031_s0, %s1507_s22  ;;  %376 = vst.msk [vmem:[#allocation2 + $0x79] sm:$0x1] %vm358_vm2, %v1774_v6  ;;  %377 = vst.msk [vmem:[#allocation2 + $0x89] sm:$0x1] %vm358_vm2, %v1774_v6  ;;  %v1462_v52 = vld [vmem:[%s2034_s3 + $0x4] sm:$0x3]  ;;  %s2006_s28 = scalar_lea.vmem %s2036_s5, %s1507_s22 }
  0x10   : > { %v1826_v2 = vld [vmem:[%s219_s25] sm:$0xff]   ;;  %v1828_v3 = vld [vmem:[%s219_s25 + $0x8] sm:$0xff]   ;;  %v1830_v4 = vld [vmem:[%s219_s25 + $0x10] sm:$0xff]   ;;  %354 = vst.msk [vmem:[#allocation2 + $0x8] sm:$0x3] %vm353_vm3, %v1774_v6 }
  0x11   : > { %1569 = vmatprep.mubr.msk.bf16.mxu0 %vm262_vm1, %v1826_v2  ;;  %v1838_v5 = vld [vmem:[%s219_s25 + $0x18] sm:$0xff]   ;;  %357 = vst.msk [vmem:[#allocation2 + $0x98] sm:$0x3] %vm353_vm3, %v1774_v6  ;;  %v1482_v53 = vld [vmem:[%s2034_s3 + $0xc] sm:$0x3] }
  0x12   : > { %1570 = vmatmul.mubr.msk.bf16.vlgmr.msra.gmra.mrb[0].mxu0 %vm262_vm1, %v1828_v3  ;;  %359 = vst.msk [vmem:[#allocation2] sm:$0x1] %vm358_vm2, %v1774_v6  ;;  %368 = vst.msk [vmem:[#allocation2 + $0x90] sm:$0x1] %vm358_vm2, %v1774_v6 }
  0x13   : > { %1573 = vmatprep.mubr.msk.bf16.mxu0 %vm262_vm1, %v1830_v4  ;;  %369 = vst.msk [vmem:[#allocation2 + $0x9] sm:$0x1] %vm358_vm2, %v1774_v6  ;;  %378 = vst.msk [vmem:[#allocation2 + $0x99] sm:$0x1] %vm358_vm2, %v1774_v6  ;;  %1578 = vmatpush3.bf16.msra.mxu0 %v422_v9 }
  0x14   : > { %1741 = vmatprep.subr.msk.bf16.mxu0 %vm275_vm0, %v1457_v12 }
  0x17   : > { %v497_v56 = vld [vmem:[#allocation2 + $0x1] sm:$0xff] }
  0x19   : > { %v396_v34 = vld [vmem:[#allocation2] sm:$0xff] }
  0x1a   : > { %1574 = vmatmul.mubr.msk.bf16.gmra.mrb[4].mxu0 %vm262_vm1, %v1838_v5 }
  0xe5   : > { %v1571_v14 = vpop.f32.mrb[0].mxu0 }
  0xe6   : > { %v322_v15 = vadd.f32 %v1571_v14, %v1443_v13  ;;  %v313_v16 = vpop.f32.mrb[1].mxu0 }
  0xe7   : > { %v314_v17 = vadd.f32 %v1443_v13, %v313_v16  ;;  %v1572_v18 = vpop.f32.mrb[2].mxu0 }
  0xe8   : > { %v346_v19 = vmax.f32 %v322_v15, 0.0  ;;  %v325_v20 = vadd.f32 %v1572_v18, %v1443_v13  ;;  %v316_v21 = vpop.f32.mrb[3].mxu0 }
  0xe9   : > { %v344_v22 = vmax.f32 %v314_v17, 0.0  ;;  %v317_v23 = vadd.f32 %v1443_v13, %v316_v21  ;;  %v1035_v17 = vsel %vm275_vm0, %v1482_v53, 0  ;;  %v1487_v21 = vld [vmem:[%s2034_s3 + $0xe] sm:$0x3] }
  0xea   : > { %382 = vst.msk [vmem:[#allocation2 + $0x31] sm:$0xff] %vm262_vm1, %v346_v19  ;;  %v347_v24 = vmax.f32 %v325_v20, 0.0  ;;  %v626_v20 = vsel %vm275_vm0, %v1462_v52, 0 }
  0xeb   : > { %380 = vst.msk [vmem:[#allocation2 + $0x11] sm:$0xff] %vm262_vm1, %v344_v22  ;;  %v345_v25 = vmax.f32 %v317_v23, 0.0  ;;  %v1467_v22 = vld [vmem:[%s2034_s3 + $0x6] sm:$0x3] }
  0xec   : > { %383 = vst.msk [vmem:[#allocation2 + $0x41] sm:$0xff] %vm262_vm1, %v347_v24  ;;  %v599_v23 = vld [vmem:[#allocation2 + $0x2] sm:$0xff] }
  0xed   : > { %381 = vst.msk [vmem:[#allocation2 + $0x21] sm:$0xff] %vm262_vm1, %v345_v25  ;;  %v1575_v26 = vpop.f32.mrb[4].mxu0 }
  0xee   : > { %v338_v27 = vadd.f32 %v1575_v26, %v1443_v13  ;;  %v329_v28 = vpop.f32.mrb[5].mxu0 }
  0xef   : > { %v330_v29 = vadd.f32 %v1443_v13, %v329_v28  ;;  %v1576_v30 = vpop.f32.mrb[6].mxu0 }
  0xf0   : > { %v350_v31 = vmax.f32 %v338_v27, 0.0  ;;  %v341_v32 = vadd.f32 %v1576_v30, %v1443_v13  ;;  %v332_v33 = vpop.f32.mrb[7].mxu0 }
  0xf1   : > { %v348_v35 = vmax.f32 %v330_v29, 0.0  ;;  %v333_v36 = vadd.f32 %v1443_v13, %v332_v33  ;;  %v1896_v41 = vld [vmem:[#allocation2 + $0x30] sm:$0xff] }
  0xf2   : > { %386 = vst.msk [vmem:[#allocation2 + $0x71] sm:$0xff] %vm262_vm1, %v350_v31  ;;  %v351_v37 = vmax.f32 %v341_v32, 0.0  ;;  %v1892_v38 = vld [vmem:[#allocation2 + $0x10] sm:$0xff]  ;;  %v1137_v31 = vsel %vm275_vm0, %v1487_v21, 0  ;;  %v728_v32 = vsel %vm275_vm0, %v1467_v22, 0 }
  0xf3   : > { %384 = vst.msk [vmem:[#allocation2 + $0x51] sm:$0xff] %vm262_vm1, %v348_v35  ;;  %v349_v39 = vmax.f32 %v333_v36, 0.0  ;;  %v404_v40 = vpack.c.bf16 %v1892_v38, %v396_v34  ;;  %v806_v42 = vld [vmem:[#allocation2 + $0x41] sm:$0xff]  ;;  %v803_v44 = vld [vmem:[#allocation2 + $0x11] sm:$0xff] }
  0xf4   : > { %387 = vst.msk [vmem:[#allocation2 + $0x81] sm:$0xff] %vm262_vm1, %v351_v37  ;;  %v1899_v43 = vld [vmem:[#allocation2 + $0x20] sm:$0xff]  ;;  %v805_v48 = vld [vmem:[#allocation2 + $0x31] sm:$0xff]  ;;  %v505_v7 = vpack.c.bf16 %v803_v44, %v497_v56 }
  0xf5   : > { %v804_v45 = vld [vmem:[#allocation2 + $0x21] sm:$0xff]  ;;  %385 = vst.msk [vmem:[#allocation2 + $0x61] sm:$0xff] %vm262_vm1, %v349_v39  ;;  %1579 = vmatprep.mubr.msk.bf16.mxu0 %vm262_vm1, %v404_v40  ;;  %v1905_v46 = vpack.c.bf16 %v1896_v41, %v1899_v43  ;;  %v812_v50 = vpack.c.bf16 %v806_v42, %v805_v48  ;;  %v905_v9 = vld [vmem:[#allocation2 + $0x12] sm:$0xff]  ;;  %v1492_v33 = vld [vmem:[%s2034_s3 + $0x10] sm:$0x3]  ;;  %v709_v37 = vpack.c.bf16 %v1899_v43, %v1892_v38 }
  0xf6   : > { %v811_v47 = vpack.c.bf16 %v804_v45, %v803_v44  ;;  %v1920_v54 = vld [vmem:[#allocation2 + $0x40] sm:$0xff]  ;;  %v506_v13 = vpack.c.bf16 %v805_v48, %v804_v45  ;;  %v907_v14 = vld [vmem:[#allocation2 + $0x32] sm:$0xff]  ;;  %v607_v27 = vpack.c.bf16 %v905_v9, %v599_v23  ;;  %v1239_v44 = vsel %vm275_vm0, %v1492_v33, 0 }
  0xf7   : > { %1580 = vmatmul.mubr.msk.bf16.vlgmr.msra.gmra.mrb[8].mxu0 %vm262_vm1, %v1905_v46  ;;  %v906_v60 = vld [vmem:[#allocation2 + $0x22] sm:$0xff]  ;;  %v1015_v35 = vld [vmem:[#allocation2 + $0x90] sm:$0xff]  ;;  %v710_v40 = vpack.c.bf16 %v1920_v54, %v1896_v41 }
  0xf8   : > { %1619 = vmatprep.mubr.msk.bf16.mxu1 %vm262_vm1, %v811_v47  ;;  %1588 = vmatpush3.bf16.msra.mxu0 %v524_v49  ;;  %v913_v10 = vpack.c.bf16 %v906_v60, %v905_v9  ;;  %v908_v11 = vld [vmem:[#allocation2 + $0x42] sm:$0xff]  ;;  %v608_v29 = vpack.c.bf16 %v907_v14, %v906_v60  ;;  %v1117_v38 = vld [vmem:[#allocation2 + $0x91] sm:$0xff]  ;;  %v1325_v9 = vunpack.c.h.bf16 %v1828_v3 }
  0xf9   : > { %1620 = vmatmul.mubr.msk.bf16.vlgmr.msra.gmra.mrb[0].mxu1 %vm262_vm1, %v812_v50  ;;  %1742 = vmatprep.subr.msk.bf16.mxu0 %vm275_vm0, %v1462_v52  ;;  %v1927_v58 = vld [vmem:[#allocation2 + $0x70] sm:$0xff]  ;;  %v914_v16 = vpack.c.bf16 %v908_v11, %v907_v14 }
  0xfa   : > { %1628 = vmatpush3.bf16.msra.mxu1 %v932_v51  ;;  %v1922_v55 = vld [vmem:[#allocation2 + $0x50] sm:$0xff] }
  0xfb   : > { %1746 = vmatprep.subr.msk.bf16.mxu1 %vm275_vm0, %v1482_v53  ;;  %v406_v57 = vpack.c.bf16 %v1922_v55, %v1920_v54  ;;  %v1929_v59 = vld [vmem:[#allocation2 + $0x81] sm:$0xff]  ;;  %v807_v62 = vld [vmem:[#allocation2 + $0x51] sm:$0xff] }
  0xfc   : > { %v1931_v61 = vld [vmem:[#allocation2 + $0x60] sm:$0xff]  ;;  %v809_v6 = vld [vmem:[#allocation2 + $0x71] sm:$0xff]  ;;  %v507_v15 = vpack.c.bf16 %v807_v62, %v806_v42  ;;  %v1121_v45 = vpack.c.bf16 %v1117_v38, %v1929_v59 }
  0xfd   : > { %v808_v63 = vld [vmem:[#allocation2 + $0x61] sm:$0xff]  ;;  %1583 = vmatprep.mubr.msk.bf16.mxu0 %vm262_vm1, %v406_v57  ;;  %v407_v0 = vpack.c.bf16 %v1927_v58, %v1931_v61  ;;  %v814_v8 = vpack.c.bf16 %v1929_v59, %v809_v6  ;;  %v909_v18 = vld [vmem:[#allocation2 + $0x52] sm:$0xff]  ;;  %v711_v42 = vpack.c.bf16 %v1931_v61, %v1922_v55  ;;  %v1452_v55 = vld [vmem:[%s2035_s4] ss:$0 sm:$0xff]  ;;  %v1324_v61 = vunpack.c.l.bf16 %v1828_v3 }
  0xfe   : > { %v813_v1 = vpack.c.bf16 %v808_v63, %v807_v62  ;;  %v910_v12 = vld [vmem:[#allocation2 + $0x62] sm:$0xff]  ;;  %v508_v25 = vpack.c.bf16 %v809_v6, %v808_v63  ;;  %v911_v26 = vld [vmem:[#allocation2 + $0x72] sm:$0xff]  ;;  %v609_v30 = vpack.c.bf16 %v909_v18, %v908_v11  ;;  %v1322_v63 = vunpack.c.l.bf16 %v1826_v2 }
  0xff   : > { %1584 = vmatmul.mubr.msk.bf16.gmra.mrb[12].mxu0 %vm262_vm1, %v407_v0  ;;  %v915_v19 = vpack.c.bf16 %v910_v12, %v909_v18  ;;  %v912_v24 = vld [vmem:[#allocation2 + $0x82] sm:$0xff]  ;;  %v610_v36 = vpack.c.bf16 %v911_v26, %v910_v12  ;;  %v1219_v41 = vld [vmem:[#allocation2 + $0x92] sm:$0xff]  ;;  %v1323_v11 = vunpack.c.h.bf16 %v1826_v2 }
 0x100   : > { %1623 = vmatprep.mubr.msk.bf16.mxu1 %vm262_vm1, %v813_v1  ;;  %1589 = vmatprep.mubr.msk.bf16.mxu0 %vm262_vm1, %v505_v7  ;;  %v916_v28 = vpack.c.bf16 %v912_v24, %v911_v26  ;;  %v1014_v34 = vld [vmem:[#allocation2 + $0x80] sm:$0xff]  ;;  %v1328_v26 = vunpack.c.l.bf16 %v1838_v5 }
 0x101   : > { %1624 = vmatmul.mubr.msk.bf16.gmra.mrb[4].mxu1 %vm262_vm1, %v814_v8  ;;  %v1019_v39 = vpack.c.bf16 %v1015_v35, %v1014_v34  ;;  %v712_v43 = vpack.c.bf16 %v1014_v34, %v1927_v58  ;;  %v1329_v35 = vunpack.c.h.bf16 %v1838_v5 }
 0x102   : > { %1629 = vmatprep.mubr.msk.bf16.mxu1 %vm262_vm1, %v913_v10 }
 0x107   : > { %1590 = vmatmul.mubr.msk.bf16.vlgmr.msra.gmra.mrb[8].mxu0 %vm262_vm1, %v506_v13 }
 0x108   : > { %1593 = vmatprep.mubr.msk.bf16.mxu0 %vm262_vm1, %v507_v15  ;;  %1598 = vmatpush3.bf16.msra.mxu0 %v626_v20 }
 0x109   : > { %1630 = vmatmul.mubr.msk.bf16.vlgmr.msra.gmra.mrb[0].mxu1 %vm262_vm1, %v914_v16  ;;  %1743 = vmatprep.subr.msk.bf16.mxu0 %vm275_vm0, %v1467_v22 }
 0x10a   : > { %1638 = vmatpush3.bf16.msra.mxu1 %v1035_v17  ;;  %1633 = vmatprep.mubr.msk.bf16.mxu1 %vm262_vm1, %v915_v19 }
 0x10b   : > { %1747 = vmatprep.subr.msk.bf16.mxu1 %vm275_vm0, %v1487_v21 }
 0x10f   : > { %1594 = vmatmul.mubr.msk.bf16.gmra.mrb[12].mxu0 %vm262_vm1, %v508_v25 }
 0x110   : > { %1599 = vmatprep.mubr.msk.bf16.mxu0 %vm262_vm1, %v607_v27 }
 0x111   : > { %1634 = vmatmul.mubr.msk.bf16.gmra.mrb[4].mxu1 %vm262_vm1, %v916_v28 }
 0x112   : > { %1639 = vmatprep.mubr.msk.bf16.mxu1 %vm262_vm1, %v1905_v46  ;;  %v1223_v46 = vpack.c.bf16 %v1219_v41, %v912_v24 }
 0x117   : > { %1600 = vmatmul.mubr.msk.bf16.vlgmr.msra.gmra.mrb[8].mxu0 %vm262_vm1, %v608_v29 }
 0x118   : > { %1603 = vmatprep.mubr.msk.bf16.mxu0 %vm262_vm1, %v609_v30  ;;  %1608 = vmatpush3.bf16.msra.mxu0 %v728_v32 }
 0x119   : > { %1640 = vmatmul.mubr.msk.bf16.vlgmr.msra.gmra.mrb[0].mxu1 %vm262_vm1, %v406_v57 }
 0x11a   : > { %1648 = vmatpush3.bf16.msra.mxu1 %v1137_v31  ;;  %1643 = vmatprep.mubr.msk.bf16.mxu1 %vm262_vm1, %v407_v0  ;;  %v1326_v31 = vunpack.c.l.bf16 %v1830_v4 }
 0x11b   : > { %1748 = vmatprep.subr.msk.bf16.mxu1 %vm275_vm0, %v1492_v33 }
 0x11f   : > { %1604 = vmatmul.mubr.msk.bf16.gmra.mrb[12].mxu0 %vm262_vm1, %v610_v36 }
 0x120   : > { %1609 = vmatprep.mubr.msk.bf16.mxu0 %vm262_vm1, %v709_v37 }
 0x121   : > { %1644 = vmatmul.mubr.msk.bf16.gmra.mrb[4].mxu1 %vm262_vm1, %v1019_v39 }
 0x122   : > { %1649 = vmatprep.mubr.msk.bf16.mxu1 %vm262_vm1, %v506_v13 }
 0x127   : > { %1610 = vmatmul.mubr.msk.bf16.vlgmr.msra.gmra.mrb[8].mxu0 %vm262_vm1, %v710_v40  ;;  %v1327_v40 = vunpack.c.h.bf16 %v1830_v4 }
 0x128   : > { %1613 = vmatprep.mubr.msk.bf16.mxu0 %vm262_vm1, %v711_v42 }
 0x129   : > { %1650 = vmatmul.mubr.msk.bf16.vlgmr.msra.gmra.mrb[0].mxu1 %vm262_vm1, %v507_v15 }
 0x12a   : > { %1658 = vmatpush3.bf16.msra.mxu1 %v1239_v44  ;;  %1653 = vmatprep.mubr.msk.bf16.mxu1 %vm262_vm1, %v508_v25 }
 0x12f   : > { %1614 = vmatmul.mubr.msk.bf16.gmra.mrb[12].mxu0 %vm262_vm1, %v712_v43 }
 0x131   : > { %1654 = vmatmul.mubr.msk.bf16.gmra.mrb[4].mxu1 %vm262_vm1, %v1121_v45 }
 0x132   : > { %1659 = vmatprep.mubr.msk.bf16.mxu1 %vm262_vm1, %v608_v29 }
 0x139   : > { %1660 = vmatmul.mubr.msk.bf16.vlgmr.msra.gmra.mrb[0].mxu1 %vm262_vm1, %v609_v30 }
 0x13a   : > { %1663 = vmatprep.mubr.msk.bf16.mxu1 %vm262_vm1, %v610_v36 }
 0x141   : > { %1664 = vmatmul.mubr.msk.bf16.gmra.mrb[4].mxu1 %vm262_vm1, %v1223_v46 }
 0x1fa   : > { %v1611_v47 = vpop.f32.mrb[8].mxu0 }
 0x1fb   : > { %v764_v48 = vpop.f32.mrb[9].mxu0  ;;  %v1667_v56 = vadd.f32 %v1611_v47, %v1452_v55 }
 0x1fc   : > { %v1612_v49 = vpop.f32.mrb[10].mxu0  ;;  %v1669_v57 = vadd.f32 %v1452_v55, %v764_v48 }
 0x1fd   : > { %v767_v50 = vpop.f32.mrb[11].mxu0  ;;  %v1671_v59 = vadd.f32 %v1612_v49, %v1452_v55 }
 0x1fe   : > { %v1673_v0 = vadd.f32 %v1452_v55, %v767_v50 }
 0x202   : > { %v1615_v51 = vpop.f32.mrb[12].mxu0 }
 0x203   : > { %v780_v52 = vpop.f32.mrb[13].mxu0  ;;  %v1675_v18 = vadd.f32 %v1615_v51, %v1452_v55 }
 0x204   : > { %v1616_v53 = vpop.f32.mrb[14].mxu0  ;;  %v1677_v20 = vadd.f32 %v1452_v55, %v780_v52 }
 0x205   : > { %v783_v54 = vpop.f32.mrb[15].mxu0  ;;  %v1679_v23 = vadd.f32 %v1616_v53, %v1452_v55 }
 0x206   : > { %v1681_v28 = vadd.f32 %v1452_v55, %v783_v54 }
 0x20c   : > { %v1661_v58 = vpop.f32.mrb[0].mxu1 }
 0x20d   : > { %v1668_v60 = vadd.f32 %v1667_v56, %v1661_v58  ;;  %v1275_v62 = vpop.f32.mrb[1].mxu1 }
 0x20e   : > { %v1670_v1 = vadd.f32 %v1669_v57, %v1275_v62  ;;  %v1662_v6 = vpop.f32.mrb[2].mxu1 }
 0x20f   : > { %v1316_v7 = vmax.f32 %v1668_v60, 0.0  ;;  %v1672_v8 = vadd.f32 %v1671_v59, %v1662_v6  ;;  %v1278_v10 = vpop.f32.mrb[3].mxu1 }
 0x210   : > { %v1314_v12 = vmax.f32 %v1670_v1, 0.0  ;;  %v1674_v13 = vadd.f32 %v1673_v0, %v1278_v10 }
 0x211   : > { %v1332_v14 = vadd.f32 %v1324_v61, %v1316_v7  ;;  %v1317_v15 = vmax.f32 %v1672_v8, 0.0 }
 0x212   : > { %v1330_v16 = vadd.f32 %v1322_v63, %v1314_v12  ;;  %v1315_v17 = vmax.f32 %v1674_v13, 0.0 }
 0x213   : > { %v1511_v3 = vpack.c.bf16 %v1332_v14, %v1332_v14  ;;  %v1333_v19 = vadd.f32 %v1325_v9, %v1317_v15 }
 0x214   : > { %v1509_v2 = vpack.c.bf16 %v1330_v16, %v1330_v16  ;;  %v1331_v21 = vadd.f32 %v1323_v11, %v1315_v17  ;;  %v1665_v22 = vpop.f32.mrb[4].mxu1 }
 0x215   : > { %1373 = vst.msk [vmem:[%s2006_s28 + $0x8] sm:$0xf] %vm1370_vm4, %v1511_v3  ;;  %v1512_v24 = vpack.c.bf16 %v1333_v19, %v1333_v19  ;;  %v1676_v25 = vadd.f32 %v1675_v18, %v1665_v22  ;;  %v1291_v27 = vpop.f32.mrb[5].mxu1 }
 0x216   : > { %1371 = vst.msk [vmem:[%s2006_s28] sm:$0xf] %vm1370_vm4, %v1509_v2  ;;  %v1510_v29 = vpack.c.bf16 %v1331_v21, %v1331_v21  ;;  %v1678_v30 = vadd.f32 %v1677_v20, %v1291_v27  ;;  %v1666_v32 = vpop.f32.mrb[6].mxu1 }
 0x217   : > { %1374 = vst.msk [vmem:[%s2006_s28 + $0xc] sm:$0xf] %vm1370_vm4, %v1512_v24  ;;  %v1320_v33 = vmax.f32 %v1676_v25, 0.0  ;;  %v1680_v34 = vadd.f32 %v1679_v23, %v1666_v32  ;;  %v1294_v36 = vpop.f32.mrb[7].mxu1 }
 0x218   : > { %1372 = vst.msk [vmem:[%s2006_s28 + $0x4] sm:$0xf] %vm1370_vm4, %v1510_v29  ;;  %v1318_v37 = vmax.f32 %v1678_v30, 0.0  ;;  %v1682_v39 = vadd.f32 %v1681_v28, %v1294_v36 }
 0x219   : > { %v1336_v42 = vadd.f32 %v1328_v26, %v1320_v33  ;;  %v1321_v44 = vmax.f32 %v1680_v34, 0.0 }
 0x21a   : > { %v1334_v38 = vadd.f32 %v1326_v31, %v1318_v37  ;;  %v1319_v43 = vmax.f32 %v1682_v39, 0.0 }
 0x21b   : > { %v1515_v45 = vpack.c.bf16 %v1336_v42, %v1336_v42  ;;  %v1337_v41 = vadd.f32 %v1329_v35, %v1321_v44 }
 0x21c   : > { %v1513_v46 = vpack.c.bf16 %v1334_v38, %v1334_v38  ;;  %v1335_v47 = vadd.f32 %v1327_v40, %v1319_v43 }
 0x21d   : > { %1377 = vst.msk [vmem:[%s2006_s28 + $0x18] sm:$0xf] %vm1370_vm4, %v1515_v45  ;;  %v1516_v5 = vpack.c.bf16 %v1337_v41, %v1337_v41 }
 0x21e   : > { %1375 = vst.msk [vmem:[%s2006_s28 + $0x10] sm:$0xf] %vm1370_vm4, %v1513_v46  ;;  %v1514_v48 = vpack.c.bf16 %v1335_v47, %v1335_v47 }
 0x21f   : > { %1378 = vst.msk [vmem:[%s2006_s28 + $0x1c] sm:$0xf] %vm1370_vm4, %v1516_v5 }
 0x220   : > { %1376 = vst.msk [vmem:[%s2006_s28 + $0x14] sm:$0xf] %vm1370_vm4, %v1514_v48 }
 0x221 PF: > { %s15_s18 = sadd.s32 1, %s1772_s18  }
 0x222   : > { %p12_p4 = scmp.ge.s32.totalorder %s15_s18, 4  }
 0x224   :  { %14 = sbr.rel (!%p12_p4) target bundleno = 1 (0x1), region = 81 }

</bundles_post_ra>
